<compile_context>
chip_gen: v7x
topology: tpu7x:2x2x1
jax: 0.10.0
libtpu: 0.0.40
codegen_flags: <defaults>
</compile_context>

<pallas_src>
import jax
import jax.numpy as jnp
from jax.experimental import pallas as pl
from jax.experimental.pallas import tpu as pltpu


def _make_kernel(apply_dropout, negative_slope):
    def kernel(*refs):
        if apply_dropout:
            x_ref, mask_ref, w1_ref, b1_ref, w2_ref, b2_ref, o_ref = refs
        else:
            x_ref, w1_ref, b1_ref, w2_ref, b2_ref, o_ref = refs
            mask_ref = None

        # Linear(latent_pad -> 768). Cast LHS to the weight dtype (no-op for f32
        # weights) so bf16 weights use the MXU's native bf16 path; accumulate f32.
        x = x_ref[...].astype(w1_ref.dtype)
        h = jnp.dot(x, w1_ref[...], preferred_element_type=jnp.float32)
        h = h + b1_ref[...].astype(jnp.float32)

        # LeakyReLU(0.2) in f32 on the VPU.
        h = jnp.where(h >= 0.0, h, negative_slope * h)

        # Dropout(0.2): host-precomputed 0/1 keep-mask; 1/(1-p) folded into W2.
        if apply_dropout:
            h = h * mask_ref[...]

        # Linear(768 -> 768).
        out = jnp.dot(h.astype(w2_ref.dtype), w2_ref[...],
                      preferred_element_type=jnp.float32)
        out = out + b2_ref[...].astype(jnp.float32)
        o_ref[...] = out.astype(o_ref.dtype)

    return kernel


def generator_forward(noise, params, *, dropout_key=None, training=True,
                      p_drop=0.2, negative_slope=0.2, block_b=256,
                      weights_dtype=None):
    """noise: (B, 100) float32. Returns (B, 768) float32 (same dtype as noise)."""
    w1, b1, w2, b2 = params          # w1: (100, 768), b1: (768,), w2: (768, 768), b2: (768,)
    B, K = noise.shape
    H = w1.shape[1]
    O = w2.shape[1]

    # Zero-pad the latent (contraction) dim to a multiple of 128 lanes.
    k_pad = ((K + 127) // 128) * 128
    if k_pad != K:
        x = jnp.pad(noise, ((0, 0), (0, k_pad - K)))
        w1 = jnp.pad(w1, ((0, k_pad - K), (0, 0)))
    else:
        x = noise

    apply_dropout = bool(training) and p_drop > 0.0
    mask = None
    if apply_dropout:
        if dropout_key is None:
            dropout_key = jax.random.PRNGKey(0)
        # TODO(synk): uses JAX's RNG, so the dropout mask will not match PyTorch's
        # RNG stream bit-for-bit (semantics — Bernoulli(1-p) keep, 1/(1-p) scale — match).
        keep = jax.random.uniform(dropout_key, (B, H), jnp.float32) >= p_drop
        mask = keep.astype(jnp.float32)
        w2 = w2 * (1.0 / (1.0 - p_drop))   # fold dropout scale into W2 (MXU absorbs it)

    if weights_dtype is not None:
        w1 = w1.astype(weights_dtype)
        w2 = w2.astype(weights_dtype)

    b1 = b1.reshape(1, H).astype(jnp.float32)
    b2 = b2.reshape(1, O).astype(jnp.float32)

    # Batch tile: 256 fills the v6e/v7x MXU (and is a multiple of v5e's 128).
    # For small batches use the full batch (block == full dim is always legal).
    tb = min(block_b, B)
    if tb < B:
        tb = max(8, (tb // 8) * 8)       # keep a sublane multiple when actually tiling
    grid = (pl.cdiv(B, tb),)

    x_spec  = pl.BlockSpec((tb, k_pad), lambda i: (i, 0))
    w1_spec = pl.BlockSpec((k_pad, H),  lambda i: (0, 0))
    b1_spec = pl.BlockSpec((1, H),      lambda i: (0, 0))
    w2_spec = pl.BlockSpec((H, O),      lambda i: (0, 0))
    b2_spec = pl.BlockSpec((1, O),      lambda i: (0, 0))
    out_spec = pl.BlockSpec((tb, O),    lambda i: (i, 0))

    if apply_dropout:
        mask_spec = pl.BlockSpec((tb, H), lambda i: (i, 0))
        in_specs = [x_spec, mask_spec, w1_spec, b1_spec, w2_spec, b2_spec]
        operands = (x, mask, w1, b1, w2, b2)
    else:
        in_specs = [x_spec, w1_spec, b1_spec, w2_spec, b2_spec]
        operands = (x, w1, b1, w2, b2)

    kernel = _make_kernel(apply_dropout, negative_slope)

    return pl.pallas_call(
        kernel,
        out_shape=jax.ShapeDtypeStruct((B, O), noise.dtype),
        grid=grid,
        in_specs=in_specs,
        out_specs=out_spec,
        compiler_params=pltpu.CompilerParams(
            dimension_semantics=("parallel",)),   # batch tiles split across TCs on v7x
    )(*operands)


def init_generator_params(key, in_dim=100, hidden=768, out_dim=768):
    """Deterministic init mimicking PyTorch Linear default U[-1/sqrt(fan_in), 1/sqrt(fan_in)]."""
    k1, k2, k3, k4 = jax.random.split(key, 4)
    bnd1 = 1.0 / (in_dim ** 0.5)
    bnd2 = 1.0 / (hidden ** 0.5)
    w1 = jax.random.uniform(k1, (in_dim, hidden), jnp.float32, -bnd1, bnd1)
    b1 = jax.random.uniform(k2, (hidden,), jnp.float32, -bnd1, bnd1)
    w2 = jax.random.uniform(k3, (hidden, out_dim), jnp.float32, -bnd2, bnd2)
    b2 = jax.random.uniform(k4, (out_dim,), jnp.float32, -bnd2, bnd2)
    return w1, b1, w2, b2


if __name__ == "__main__":
    key = jax.random.PRNGKey(0)
    k_params, k_noise, k_drop = jax.random.split(key, 3)

    params = init_generator_params(k_params)
    noise = jax.random.normal(k_noise, (8, 100), dtype=jnp.float32)  # batch=8, latent=100

    # Training mode: dropout active (deterministic mask from k_drop).
    out_train = jax.block_until_ready(
        generator_forward(noise, params, dropout_key=k_drop, training=True, p_drop=0.2))
    assert out_train.shape == (8, 768) and out_train.dtype == jnp.float32
    assert bool(jnp.all(jnp.isfinite(out_train)))

    # Eval mode: check against a pure-JAX reference.
    out_eval = jax.block_until_ready(generator_forward(noise, params, training=False))
    w1, b1, w2, b2 = params
    h_ref = noise @ w1 + b1
    h_ref = jnp.where(h_ref >= 0.0, h_ref, 0.2 * h_ref)
    ref = h_ref @ w2 + b2
    assert jnp.allclose(out_eval, ref, atol=1e-4, rtol=1e-4)

    # bf16-weight path (halves weight DMA; native MXU bf16 rate on v6e/v7x).
    out_bf16 = jax.block_until_ready(
        generator_forward(noise, params, training=False, weights_dtype=jnp.bfloat16))
    assert out_bf16.shape == (8, 768) and bool(jnp.all(jnp.isfinite(out_bf16)))

    print("KERNEL_OK")
</pallas_src>

<mosaic_0001>
module attributes {stable_mosaic.version = 11 : i64} {
  func.func @kernel(%arg0: i32, %arg1: memref<8x128xf32, #tpu.memory_space<vmem>>, %arg2: memref<8x768xf32, #tpu.memory_space<vmem>>, %arg3: memref<128x768xf32, #tpu.memory_space<vmem>>, %arg4: memref<1x768xf32, #tpu.memory_space<vmem>>, %arg5: memref<768x768xf32, #tpu.memory_space<vmem>>, %arg6: memref<1x768xf32, #tpu.memory_space<vmem>>, %arg7: memref<8x768xf32, #tpu.memory_space<vmem>>) attributes {dimension_semantics = [#tpu.dimension_semantics<parallel>], iteration_bounds = array<i64: 1>, scalar_prefetch = 0 : i64, scratch_operands = 0 : i64, tpu.core_type = #tpu.core_type<tc>, window_params = [{transform_indices = @transform_0, window_bounds = array<i64: 8, 128>}, {transform_indices = @transform_1, window_bounds = array<i64: 8, 768>}, {pipeline_mode = #tpu.pipeline_mode<synchronous>, transform_indices = @transform_2, window_bounds = array<i64: 128, 768>}, {pipeline_mode = #tpu.pipeline_mode<synchronous>, transform_indices = @transform_3, window_bounds = array<i64: 1, 768>}, {pipeline_mode = #tpu.pipeline_mode<synchronous>, transform_indices = @transform_4, window_bounds = array<i64: 768, 768>}, {pipeline_mode = #tpu.pipeline_mode<synchronous>, transform_indices = @transform_5, window_bounds = array<i64: 1, 768>}, {transform_indices = @transform_6, window_bounds = array<i64: 8, 768>}]} {
    %c0 = arith.constant 0 : index
    %c0_0 = arith.constant 0 : index
    %0 = vector.load %arg1[%c0, %c0_0] : memref<8x128xf32, #tpu.memory_space<vmem>>, vector<8x128xf32>
    %c0_1 = arith.constant 0 : index
    %c0_2 = arith.constant 0 : index
    %1 = vector.load %arg3[%c0_1, %c0_2] : memref<128x768xf32, #tpu.memory_space<vmem>>, vector<128x768xf32>
    %cst = arith.constant dense<0.000000e+00> : vector<8x768xf32>
    %2 = tpu.matmul %0, %1, %cst {dimension_numbers = #tpu.dot_dimension_numbers<[1], [0], [0], [1], [0, 0, 1, 1], [], []>} : vector<8x128xf32>, vector<128x768xf32>, vector<8x768xf32> -> vector<8x768xf32>
    %c0_3 = arith.constant 0 : index
    %c0_4 = arith.constant 0 : index
    %3 = vector.load %arg4[%c0_3, %c0_4] : memref<1x768xf32, #tpu.memory_space<vmem>>, vector<1x768xf32>
    %4 = vector.broadcast %3 : vector<1x768xf32> to vector<8x768xf32>
    %5 = arith.addf %2, %4 : vector<8x768xf32>
    %cst_5 = arith.constant 0.000000e+00 : f32
    %6 = vector.broadcast %cst_5 : f32 to vector<8x768xf32>
    %7 = arith.cmpf oge, %5, %6 : vector<8x768xf32>
    %cst_6 = arith.constant 2.000000e-01 : f32
    %8 = vector.broadcast %cst_6 : f32 to vector<8x768xf32>
    %9 = arith.mulf %8, %5 : vector<8x768xf32>
    %10 = arith.select %7, %5, %9 : vector<8x768xi1>, vector<8x768xf32>
    %c0_7 = arith.constant 0 : index
    %c0_8 = arith.constant 0 : index
    %11 = vector.load %arg2[%c0_7, %c0_8] : memref<8x768xf32, #tpu.memory_space<vmem>>, vector<8x768xf32>
    %12 = arith.mulf %10, %11 : vector<8x768xf32>
    %c0_9 = arith.constant 0 : index
    %c0_10 = arith.constant 0 : index
    %13 = vector.load %arg5[%c0_9, %c0_10] : memref<768x768xf32, #tpu.memory_space<vmem>>, vector<768x768xf32>
    %cst_11 = arith.constant dense<0.000000e+00> : vector<8x768xf32>
    %14 = tpu.matmul %12, %13, %cst_11 {dimension_numbers = #tpu.dot_dimension_numbers<[1], [0], [0], [1], [0, 0, 1, 1], [], []>} : vector<8x768xf32>, vector<768x768xf32>, vector<8x768xf32> -> vector<8x768xf32>
    %c0_12 = arith.constant 0 : index
    %c0_13 = arith.constant 0 : index
    %15 = vector.load %arg6[%c0_12, %c0_13] : memref<1x768xf32, #tpu.memory_space<vmem>>, vector<1x768xf32>
    %16 = vector.broadcast %15 : vector<1x768xf32> to vector<8x768xf32>
    %17 = arith.addf %14, %16 : vector<8x768xf32>
    %c0_14 = arith.constant 0 : index
    %c0_15 = arith.constant 0 : index
    %18 = vector.load %arg7[%c0_14, %c0_15] : memref<8x768xf32, #tpu.memory_space<vmem>>, vector<8x768xf32>
    tpu.vector_store %arg7[%c0_14, %c0_15], %17 {strides = array<i32>} : memref<8x768xf32, #tpu.memory_space<vmem>>, vector<8x768xf32>,
    return
  }
  func.func @transform_0(%arg0: i32) -> (i32, i32) {
    %c0_i32 = arith.constant 0 : i32
    %c0_i32_0 = arith.constant 0 : i32
    return %arg0, %c0_i32 : i32, i32
  }
  func.func @transform_1(%arg0: i32) -> (i32, i32) {
    %c0_i32 = arith.constant 0 : i32
    %c0_i32_0 = arith.constant 0 : i32
    return %arg0, %c0_i32 : i32, i32
  }
  func.func @transform_2(%arg0: i32) -> (i32, i32) {
    %c0_i32 = arith.constant 0 : i32
    %c0_i32_0 = arith.constant 0 : i32
    %c0_i32_1 = arith.constant 0 : i32
    return %c0_i32, %c0_i32_0 : i32, i32
  }
  func.func @transform_3(%arg0: i32) -> (i32, i32) {
    %c0_i32 = arith.constant 0 : i32
    %c0_i32_0 = arith.constant 0 : i32
    %c0_i32_1 = arith.constant 0 : i32
    return %c0_i32, %c0_i32_0 : i32, i32
  }
  func.func @transform_4(%arg0: i32) -> (i32, i32) {
    %c0_i32 = arith.constant 0 : i32
    %c0_i32_0 = arith.constant 0 : i32
    %c0_i32_1 = arith.constant 0 : i32
    return %c0_i32, %c0_i32_0 : i32, i32
  }
  func.func @transform_5(%arg0: i32) -> (i32, i32) {
    %c0_i32 = arith.constant 0 : i32
    %c0_i32_0 = arith.constant 0 : i32
    %c0_i32_1 = arith.constant 0 : i32
    return %c0_i32, %c0_i32_0 : i32, i32
  }
  func.func @transform_6(%arg0: i32) -> (i32, i32) {
    %c0_i32 = arith.constant 0 : i32
    %c0_i32_0 = arith.constant 0 : i32
    return %arg0, %c0_i32 : i32, i32
  }
}

</mosaic_0001>

<bundles_post_ra>
// kernel: tpu_custom_call.1
= control target key start
LH: loop header
LB: loop body
LE: loop exit
PB: predicated region body
PF: predicated region fallthrough
CT: control target
= control target key end

     0   :  { %11 = vsyncpa [#allocation3], 0  ;;  %s2828_s0 = inlined_call_operand.hbm [shape: f32[8,128], index: 0, kind: input, shape index: {}]   ;;  %s2829_s1 = inlined_call_operand.hbm [shape: f32[8,768], index: 1, kind: input, shape index: {}]   ;;  %s2830_s2 = inlined_call_operand.hbm [shape: f32[128,768], index: 2, kind: input, shape index: {}]   ;;  %s2831_s3 = inlined_call_operand.hbm [shape: f32[1,768], index: 3, kind: input, shape index: {}]   ;;  %s2832_s4 = inlined_call_operand.hbm [shape: f32[768,768], index: 4, kind: input, shape index: {}]   ;;  %s2833_s5 = inlined_call_operand.hbm [shape: f32[1,768], index: 5, kind: input, shape index: {}]   ;;  %s2834_s6 = inlined_call_operand.hbm [shape: f32[8,768], index: 6, kind: output, shape index: {}]  }
   0x1   :  { %12 = vsyncpa [#allocation6], 0 }
   0x2   :  { %13 = vsyncpa [#allocation9], 0 }
   0x3   :  { %14 = vsyncpa [#allocation12], 0 }
   0x4   :  { %15 = vsyncpa [#allocation4], 0  ;;  %s2605_s21 = smov [#allocation5]   ;;  %s2606_s23 = smov [#allocation8]  }
   0x5   :  { %s32_s22 = sshll.u32 %s2605_s21, 4  ;;  %s54_s24 = sshll.u32 %s2606_s23, 4  ;;  %s33_s22 = int_to_ptr.vmem [resolvable:$true] %s32_s22  ;;  %s55_s24 = int_to_ptr.vmem [resolvable:$true] %s54_s24 }
   0x6   :  { %s2441_s27 = scalar_lea.hbm %s2829_s1, 768 }
   0x7   :  { %p2442_p0 = scmp.ne.s32.totalorder %s2829_s1, %s2441_s27  ;;  %p2445_p1 = scmp.lt.u32.totalorder %s2441_s27, %s2829_s1 }
   0x9   :  { %p2447_p2 = pnand %p2445_p1, %p2442_p0 }
   0xb   :  { %2450 = shalt.err (!%p2447_p2)
}
   0xc   :  { %s2451_s8 = scalar_lea.vmem %s33_s22, 768  ;;  %p2456_p4 = scmp.lt.s32.totalorder %s33_s22, %s33_s22 }
   0xd   :  { %p2452_p3 = scmp.ne.s32.totalorder %s33_s22, %s2451_s8  ;;  %p2457_p5 = scmp.lt.s32.totalorder %s2451_s8, %s2451_s8 }
   0xf   :  { %p2458_p6 = por %p2457_p5, %p2456_p4 }
  0x11   :  { %p2459_p7 = pnand %p2458_p6, %p2452_p3 }
  0x13   :  { %2462 = shalt.err (!%p2459_p7)
}
  0x14   :  { %35 = dma.hbm_to_vmem [thread:$0]  %s2829_s1, 768, %s33_s22, [#allocation6]  }
  0x15   :  { %s2463_s13 = scalar_lea.hbm %s2831_s3, 96 }
  0x16   :  { %p2464_p8 = scmp.ne.s32.totalorder %s2831_s3, %s2463_s13  ;;  %p2467_p9 = scmp.lt.u32.totalorder %s2463_s13, %s2831_s3 }
  0x18   :  { %p2469_p10 = pnand %p2467_p9, %p2464_p8 }
  0x1a   :  { %2472 = shalt.err (!%p2469_p10)
}
  0x1b   :  { %s2473_s18 = scalar_lea.vmem %s55_s24, 96  ;;  %p2478_p12 = scmp.lt.s32.totalorder %s55_s24, %s55_s24 }
  0x1c   :  { %p2474_p11 = scmp.ne.s32.totalorder %s55_s24, %s2473_s18  ;;  %p2479_p13 = scmp.lt.s32.totalorder %s2473_s18, %s2473_s18 }
  0x1e   :  { %p2480_p0 = por %p2479_p13, %p2478_p12 }
  0x20   :  { %p2481_p1 = pnand %p2480_p0, %p2474_p11 }
  0x22   :  { %2484 = shalt.err (!%p2481_p1)
}
  0x23   :  { %57 = dma.hbm_to_vmem [thread:$0]  %s2831_s3, 96, %s55_s24, [#allocation9]  }
  0x24   :  { %s2607_s20 = smov [#allocation2]   ;;  %s2608_s22 = smov [#allocation7]  }
  0x25   :  { %s22_s21 = sshll.u32 %s2607_s20, 4  ;;  %s41_s23 = sshll.u32 %s2608_s22, 4  ;;  %s23_s21 = int_to_ptr.vmem [resolvable:$true] %s22_s21  ;;  %s2674_s23 = int_to_ptr.vmem [resolvable:$true] %s41_s23 }
  0x26   :  { %s2485_s27 = scalar_lea.hbm %s2828_s0, 128 }
  0x27   :  { %p2486_p2 = scmp.ne.s32.totalorder %s2828_s0, %s2485_s27  ;;  %p2489_p3 = scmp.lt.u32.totalorder %s2485_s27, %s2828_s0 }
  0x29   :  { %p2491_p4 = pnand %p2489_p3, %p2486_p2 }
  0x2b   :  { %2494 = shalt.err (!%p2491_p4)
}
  0x2c   :  { %s2495_s3 = scalar_lea.vmem %s23_s21, 128  ;;  %p2500_p6 = scmp.lt.s32.totalorder %s23_s21, %s23_s21 }
  0x2d   :  { %p2496_p5 = scmp.ne.s32.totalorder %s23_s21, %s2495_s3  ;;  %p2501_p7 = scmp.lt.s32.totalorder %s2495_s3, %s2495_s3 }
  0x2f   :  { %p2502_p8 = por %p2501_p7, %p2500_p6 }
  0x31   :  { %p2503_p9 = pnand %p2502_p8, %p2496_p5 }
  0x33   :  { %2506 = shalt.err (!%p2503_p9)
}
  0x34   :  { %25 = dma.hbm_to_vmem [thread:$0]  %s2828_s0, 128, %s23_s21, [#allocation3]  }
  0x35   :  { %s2507_s11 = scalar_lea.hbm %s2830_s2, 12288 }
  0x36   :  { %p2508_p10 = scmp.ne.s32.totalorder %s2830_s2, %s2507_s11  ;;  %p2511_p11 = scmp.lt.u32.totalorder %s2507_s11, %s2830_s2 }
  0x38   :  { %p2513_p12 = pnand %p2511_p11, %p2508_p10 }
  0x3a   :  { %2516 = shalt.err (!%p2513_p12)
}
  0x3b   :  { %s2517_s16 = scalar_lea.vmem %s2674_s23, 12288  ;;  %p2522_p0 = scmp.lt.s32.totalorder %s2674_s23, %s2674_s23 }
  0x3c   :  { %p2518_p13 = scmp.ne.s32.totalorder %s2674_s23, %s2517_s16  ;;  %p2523_p1 = scmp.lt.s32.totalorder %s2517_s16, %s2517_s16 }
  0x3e   :  { %p2524_p2 = por %p2523_p1, %p2522_p0 }
  0x40   :  { %p2525_p3 = pnand %p2524_p2, %p2518_p13 }
  0x42   :  { %2528 = shalt.err (!%p2525_p3)
}
  0x43   :  { %s2609_s0 = smov 768   ;;  %s2610_s17 = smov 48  }
  0x44   :  { %47 = dma.hbm_to_vmem [thread:$0]  %s2830_s2, 12288, %s2674_s23, [#allocation6], %s2609_s0, %s2609_s0, %s2610_s17  }
  0x45   :  { %s2611_s19 = smov [#allocation10]   ;;  %s2612_s21 = smov [#allocation11]  }
  0x46   :  { %s63_s20 = sshll.u32 %s2611_s19, 4  ;;  %s76_s22 = sshll.u32 %s2612_s21, 4  ;;  %s64_s20 = int_to_ptr.vmem [resolvable:$true] %s63_s20  ;;  %s77_s22 = int_to_ptr.vmem [resolvable:$true] %s76_s22 }
  0x47   :  { %s2529_s27 = scalar_lea.hbm %s2832_s4, 73728 }
  0x48   :  { %p2530_p4 = scmp.ne.s32.totalorder %s2832_s4, %s2529_s27  ;;  %p2533_p5 = scmp.lt.u32.totalorder %s2529_s27, %s2832_s4 }
  0x4a   :  { %p2535_p6 = pnand %p2533_p5, %p2530_p4 }
  0x4c   :  { %2538 = shalt.err (!%p2535_p6)
}
  0x4d   :  { %s2539_s2 = scalar_lea.vmem %s64_s20, 73728  ;;  %p2544_p8 = scmp.lt.s32.totalorder %s64_s20, %s64_s20 }
  0x4e   :  { %p2540_p7 = scmp.ne.s32.totalorder %s64_s20, %s2539_s2  ;;  %p2545_p9 = scmp.lt.s32.totalorder %s2539_s2, %s2539_s2 }
  0x50   :  { %p2546_p10 = por %p2545_p9, %p2544_p8 }
  0x52   :  { %p2547_p11 = pnand %p2546_p10, %p2540_p7 }
  0x54   :  { %2550 = shalt.err (!%p2547_p11)
}
  0x55   :  { %69 = dma.hbm_to_vmem [thread:$0]  %s2832_s4, 73728, %s64_s20, [#allocation9], %s2609_s0, %s2609_s0, %s2610_s17  }
  0x56   :  { %s2551_s9 = scalar_lea.hbm %s2833_s5, 96 }
  0x57   :  { %p2552_p12 = scmp.ne.s32.totalorder %s2833_s5, %s2551_s9  ;;  %p2555_p13 = scmp.lt.u32.totalorder %s2551_s9, %s2833_s5 }
  0x59   :  { %p2557_p0 = pnand %p2555_p13, %p2552_p12 }
  0x5b   :  { %2560 = shalt.err (!%p2557_p0)
}
  0x5c   :  { %s2561_s14 = scalar_lea.vmem %s77_s22, 96  ;;  %p2566_p2 = scmp.lt.s32.totalorder %s77_s22, %s77_s22 }
  0x5d   :  { %p2562_p1 = scmp.ne.s32.totalorder %s77_s22, %s2561_s14  ;;  %p2567_p3 = scmp.lt.s32.totalorder %s2561_s14, %s2561_s14 }
  0x5f   :  { %p2568_p4 = por %p2567_p3, %p2566_p2 }
  0x61   :  { %p2569_p5 = pnand %p2568_p4, %p2562_p1 }
  0x63   :  { %2572 = shalt.err (!%p2569_p5)
}
  0x64   :  { %79 = dma.hbm_to_vmem [thread:$0]  %s2833_s5, 96, %s77_s22, [#allocation12]  }
  0x65   :  { %2595 = dma.done.wait [#allocation3], 128  }
  0x66   :  { %2596 = vsyncadd [#allocation3], 4294967168 }
  0x67   :  { %2597 = dma.done.wait [#allocation6], 13056  }
  0x68   :  { %2598 = vsyncadd [#allocation6], 4294954240 }
  0x69   :  { %2599 = dma.done.wait [#allocation9], 73824  }
  0x6a   :  { %2600 = vsyncadd [#allocation9], 4294893472 }
  0x6b   :  { %2601 = dma.done.wait [#allocation12], 96  }
  0x6c   :  { %2602 = vsyncadd [#allocation12], 4294967200  ;;  %v2613_v0 = vmov 0.0   ;;  %v100_v1 = vld [vmem:[#allocation7 + $0x8] sm:$0xff]  ;;  %v106_v2 = vld [vmem:[#allocation7 + $0x38] sm:$0xff]  ;;  %s2614_s5 = smov [#allocation13]  }
  0x6d   :  { %291 = vmatprep.mubr.f32.mxu0 %v2613_v0  ;;  %362 = vmatprep.mubr.f32.mxu1 %v2613_v0  ;;  %v102_v3 = vld [vmem:[#allocation7 + $0x18] sm:$0xff]  ;;  %v1741_v4 = vpack.c.bf16 %v106_v2, %v100_v1  ;;  %v108_v5 = vld [vmem:[#allocation7 + $0x48] sm:$0xff]  ;;  %v99_v6 = vld [vmem:[#allocation7] sm:$0xff]  ;;  %s1729_s16 = sshll.u32 %s2614_s5, 4  ;;  %s1730_s16 = int_to_ptr.vmem [resolvable:$true] %s1729_s16 }
  0x6e   :  { %v105_v7 = vld [vmem:[#allocation7 + $0x30] sm:$0xff]  ;;  %v1773_v8 = vpack.c.bf16 %v108_v5, %v102_v3  ;;  %v107_v11 = vld [vmem:[#allocation7 + $0x40] sm:$0xff]  ;;  %v112_v12 = vld [vmem:[#allocation7 + $0x68] sm:$0xff]  ;;  %s2573_s0 = scalar_lea.vmem %s1730_s16, 768  ;;  %p2578_p7 = scmp.lt.s32.totalorder %s1730_s16, %s1730_s16 }
  0x6f   :  { %v1743_v9 = vpack.c.bf16 %v105_v7, %v99_v6  ;;  %v101_v10 = vld [vmem:[#allocation7 + $0x10] sm:$0xff]  ;;  %1742 = vmatprep.subr.bf16.mxu0 %v1741_v4  ;;  %v118_v14 = vld [vmem:[#allocation7 + $0x98] sm:$0xff]  ;;  %v120_v16 = vld [vmem:[#allocation7 + $0xa8] sm:$0xff]  ;;  %p2574_p6 = scmp.ne.s32.totalorder %s1730_s16, %s2573_s0  ;;  %p2579_p8 = scmp.lt.s32.totalorder %s2573_s0, %s2573_s0 }
  0x70   :  { %v1775_v13 = vpack.c.bf16 %v107_v11, %v101_v10  ;;  %v114_v15 = vld [vmem:[#allocation7 + $0x78] sm:$0xff]  ;;  %1774 = vmatprep.subr.bf16.mxu1 %v1773_v8  ;;  %v1745_v17 = vpack.c.bf16 %v118_v14, %v112_v12  ;;  %v111_v19 = vld [vmem:[#allocation7 + $0x60] sm:$0xff]  ;;  %v117_v20 = vld [vmem:[#allocation7 + $0x90] sm:$0xff] }
  0x71   :  { %1744 = vmatpush1.bf16.msra.mxu0 %v1743_v9  ;;  %v1777_v18 = vpack.c.bf16 %v120_v16, %v114_v15  ;;  %v113_v21 = vld [vmem:[#allocation7 + $0x70] sm:$0xff]  ;;  %v1747_v22 = vpack.c.bf16 %v117_v20, %v111_v19  ;;  %v119_v23 = vld [vmem:[#allocation7 + $0xa0] sm:$0xff]  ;;  %v124_v24 = vld [vmem:[#allocation7 + $0xc8] sm:$0xff]  ;;  %p2580_p9 = por %p2579_p8, %p2578_p7 }
  0x72   :  { %1776 = vmatpush1.bf16.msra.mxu1 %v1775_v13  ;;  %v130_v25 = vld [vmem:[#allocation7 + $0xf8] sm:$0xff]  ;;  %1746 = vmatprep.subr.bf16.mxu0 %v1745_v17  ;;  %v1779_v26 = vpack.c.bf16 %v119_v23, %v113_v21  ;;  %v132_v29 = vld [vmem:[#allocation7 + $0x108] sm:$0xff]  ;;  %v123_v30 = vld [vmem:[#allocation7 + $0xc0] sm:$0xff] }
  0x73   :  { %1778 = vmatprep.subr.bf16.mxu1 %v1777_v18  ;;  %v1749_v27 = vpack.c.bf16 %v130_v25, %v124_v24  ;;  %v126_v28 = vld [vmem:[#allocation7 + $0xd8] sm:$0xff]  ;;  %v129_v32 = vld [vmem:[#allocation7 + $0xf0] sm:$0xff]  ;;  %v131_v34 = vld [vmem:[#allocation7 + $0x100] sm:$0xff]  ;;  %p2581_p10 = pnand %p2580_p9, %p2574_p6 }
  0x74   :  { %v1781_v31 = vpack.c.bf16 %v132_v29, %v126_v28  ;;  %v125_v33 = vld [vmem:[#allocation7 + $0xd0] sm:$0xff]  ;;  %v1751_v35 = vpack.c.bf16 %v129_v32, %v123_v30  ;;  %v136_v36 = vld [vmem:[#allocation7 + $0x128] sm:$0xff]  ;;  %v142_v37 = vld [vmem:[#allocation7 + $0x158] sm:$0xff] }
  0x75   :  { %1748 = vmatpush1.bf16.msra.mxu0 %v1747_v22  ;;  %v138_v38 = vld [vmem:[#allocation7 + $0x138] sm:$0xff]  ;;  %v1783_v39 = vpack.c.bf16 %v131_v34, %v125_v33  ;;  %v1753_v40 = vpack.c.bf16 %v142_v37, %v136_v36  ;;  %v144_v41 = vld [vmem:[#allocation7 + $0x168] sm:$0xff]  ;;  %v135_v42 = vld [vmem:[#allocation7 + $0x120] sm:$0xff] }
  0x76   :  { %1780 = vmatpush1.bf16.msra.mxu1 %v1779_v26  ;;  %1750 = vmatprep.subr.bf16.mxu0 %v1749_v27  ;;  %v141_v43 = vld [vmem:[#allocation7 + $0x150] sm:$0xff]  ;;  %v1785_v44 = vpack.c.bf16 %v144_v41, %v138_v38  ;;  %v143_v46 = vld [vmem:[#allocation7 + $0x160] sm:$0xff]  ;;  %v148_v47 = vld [vmem:[#allocation7 + $0x188] sm:$0xff] }
  0x77   :  { %1782 = vmatprep.subr.bf16.mxu1 %v1781_v31  ;;  %v137_v45 = vld [vmem:[#allocation7 + $0x130] sm:$0xff]  ;;  %v154_v48 = vld [vmem:[#allocation7 + $0x1b8] sm:$0xff]  ;;  %v156_v50 = vld [vmem:[#allocation7 + $0x1c8] sm:$0xff]  ;;  %v1755_v51 = vpack.c.bf16 %v141_v43, %v135_v42 }
  0x78   :  { %v150_v49 = vld [vmem:[#allocation7 + $0x198] sm:$0xff]  ;;  %v1787_v52 = vpack.c.bf16 %v143_v46, %v137_v45  ;;  %v1757_v53 = vpack.c.bf16 %v154_v48, %v148_v47  ;;  %v147_v54 = vld [vmem:[#allocation7 + $0x180] sm:$0xff]  ;;  %v153_v55 = vld [vmem:[#allocation7 + $0x1b0] sm:$0xff] }
  0x79   :  { %1752 = vmatpush1.bf16.msra.mxu0 %v1751_v35  ;;  %v149_v56 = vld [vmem:[#allocation7 + $0x190] sm:$0xff]  ;;  %v1789_v57 = vpack.c.bf16 %v156_v50, %v150_v49  ;;  %v155_v58 = vld [vmem:[#allocation7 + $0x1c0] sm:$0xff]  ;;  %v160_v59 = vld [vmem:[#allocation7 + $0x1e8] sm:$0xff]  ;;  %v1759_v63 = vpack.c.bf16 %v153_v55, %v147_v54 }
  0x7a   :  { %1784 = vmatpush1.bf16.msra.mxu1 %v1783_v39  ;;  %1754 = vmatprep.subr.bf16.mxu0 %v1753_v40  ;;  %v166_v60 = vld [vmem:[#allocation7 + $0x218] sm:$0xff]  ;;  %v168_v62 = vld [vmem:[#allocation7 + $0x228] sm:$0xff]  ;;  %v1791_v1 = vpack.c.bf16 %v155_v58, %v149_v56  ;;  %v159_v3 = vld [vmem:[#allocation7 + $0x1e0] sm:$0xff] }
  0x7b   :  { %1786 = vmatprep.subr.bf16.mxu1 %v1785_v44  ;;  %v162_v61 = vld [vmem:[#allocation7 + $0x1f8] sm:$0xff]  ;;  %v1761_v2 = vpack.c.bf16 %v166_v60, %v160_v59  ;;  %v165_v4 = vld [vmem:[#allocation7 + $0x210] sm:$0xff]  ;;  %v167_v7 = vld [vmem:[#allocation7 + $0x220] sm:$0xff] }
  0x7c   :  { %v161_v5 = vld [vmem:[#allocation7 + $0x1f0] sm:$0xff]  ;;  %v1793_v6 = vpack.c.bf16 %v168_v62, %v162_v61  ;;  %v172_v8 = vld [vmem:[#allocation7 + $0x248] sm:$0xff]  ;;  %v178_v9 = vld [vmem:[#allocation7 + $0x278] sm:$0xff]  ;;  %v1763_v12 = vpack.c.bf16 %v165_v4, %v159_v3 }
  0x7d   :  { %1756 = vmatpush1.bf16.msra.mxu0 %v1755_v51  ;;  %v174_v10 = vld [vmem:[#allocation7 + $0x258] sm:$0xff]  ;;  %v180_v11 = vld [vmem:[#allocation7 + $0x288] sm:$0xff]  ;;  %v1795_v13 = vpack.c.bf16 %v167_v7, %v161_v5  ;;  %v1765_v14 = vpack.c.bf16 %v178_v9, %v172_v8  ;;  %v171_v15 = vld [vmem:[#allocation7 + $0x240] sm:$0xff] }
  0x7e   :  { %1788 = vmatpush1.bf16.msra.mxu1 %v1787_v52  ;;  %1758 = vmatprep.subr.bf16.mxu0 %v1757_v53  ;;  %v177_v16 = vld [vmem:[#allocation7 + $0x270] sm:$0xff]  ;;  %v1797_v18 = vpack.c.bf16 %v180_v11, %v174_v10  ;;  %v179_v19 = vld [vmem:[#allocation7 + $0x280] sm:$0xff]  ;;  %v184_v20 = vld [vmem:[#allocation7 + $0x2a8] sm:$0xff] }
  0x7f   :  { %1790 = vmatprep.subr.bf16.mxu1 %v1789_v57  ;;  %v173_v17 = vld [vmem:[#allocation7 + $0x250] sm:$0xff]  ;;  %v190_v21 = vld [vmem:[#allocation7 + $0x2d8] sm:$0xff]  ;;  %v192_v23 = vld [vmem:[#allocation7 + $0x2e8] sm:$0xff]  ;;  %v1767_v24 = vpack.c.bf16 %v177_v16, %v171_v15 }
  0x80   :  { %v186_v22 = vld [vmem:[#allocation7 + $0x2b8] sm:$0xff]  ;;  %v1799_v25 = vpack.c.bf16 %v179_v19, %v173_v17  ;;  %v1769_v26 = vpack.c.bf16 %v190_v21, %v184_v20  ;;  %v183_v27 = vld [vmem:[#allocation7 + $0x2a0] sm:$0xff]  ;;  %v189_v28 = vld [vmem:[#allocation7 + $0x2d0] sm:$0xff] }
  0x81   :  { %1760 = vmatpush1.bf16.msra.mxu0 %v1759_v63  ;;  %v185_v29 = vld [vmem:[#allocation7 + $0x2b0] sm:$0xff]  ;;  %v1801_v30 = vpack.c.bf16 %v192_v23, %v186_v22  ;;  %v191_v31 = vld [vmem:[#allocation7 + $0x2e0] sm:$0xff]  ;;  %v104_v32 = vld [vmem:[#allocation7 + $0x28] sm:$0xff]  ;;  %v1771_v34 = vpack.c.bf16 %v189_v28, %v183_v27 }
  0x82   :  { %1792 = vmatpush1.bf16.msra.mxu1 %v1791_v1  ;;  %1762 = vmatprep.subr.bf16.mxu0 %v1761_v2  ;;  %v110_v33 = vld [vmem:[#allocation7 + $0x58] sm:$0xff]  ;;  %v1803_v35 = vpack.c.bf16 %v191_v31, %v185_v29  ;;  %v103_v37 = vld [vmem:[#allocation7 + $0x20] sm:$0xff]  ;;  %v109_v38 = vld [vmem:[#allocation7 + $0x50] sm:$0xff] }
  0x83   :  { %1794 = vmatprep.subr.bf16.mxu1 %v1793_v6  ;;  %v1805_v36 = vpack.c.bf16 %v110_v33, %v104_v32  ;;  %v116_v39 = vld [vmem:[#allocation7 + $0x88] sm:$0xff]  ;;  %v122_v40 = vld [vmem:[#allocation7 + $0xb8] sm:$0xff]  ;;  %v1807_v42 = vpack.c.bf16 %v109_v38, %v103_v37  ;;  %v115_v43 = vld [vmem:[#allocation7 + $0x80] sm:$0xff] }
  0x84   :  { %v2731_v41 = vld [vmem:[#allocation2] sm:$0xff]  ;;  %v121_v44 = vld [vmem:[#allocation7 + $0xb0] sm:$0xff]  ;;  %v1809_v45 = vpack.c.bf16 %v122_v40, %v116_v39  ;;  %v669_v48 = vld [vmem:[#allocation10 + $0x638] sm:$0xff] }
  0x85   :  { %1764 = vmatpush1.bf16.msra.mxu0 %v1763_v12  ;;  %v128_v46 = vld [vmem:[#allocation7 + $0xe8] sm:$0xff]  ;;  %v134_v49 = vld [vmem:[#allocation7 + $0x118] sm:$0xff]  ;;  %v1811_v55 = vpack.c.bf16 %v121_v44, %v115_v43  ;;  %v127_v56 = vld [vmem:[#allocation7 + $0xe0] sm:$0xff] }
  0x86   :  { %1796 = vmatpush1.bf16.msra.mxu1 %v1795_v13  ;;  %1766 = vmatprep.subr.bf16.mxu0 %v1765_v14  ;;  %v663_v47 = vld [vmem:[#allocation10 + $0x608] sm:$0xff]  ;;  %v662_v51 = vld [vmem:[#allocation10 + $0x600] sm:$0xff]  ;;  %v668_v52 = vld [vmem:[#allocation10 + $0x630] sm:$0xff]  ;;  %v1813_v59 = vpack.c.bf16 %v134_v49, %v128_v46 }
  0x87   :  { %1798 = vmatprep.subr.bf16.mxu1 %v1797_v18  ;;  %v1901_v50 = vpack.c.bf16 %v669_v48, %v663_v47  ;;  %v1903_v53 = vpack.c.bf16 %v668_v52, %v662_v51  ;;  %v675_v54 = vld [vmem:[#allocation10 + $0x668] sm:$0xff]  ;;  %v681_v58 = vld [vmem:[#allocation10 + $0x698] sm:$0xff]  ;;  %v674_v62 = vld [vmem:[#allocation10 + $0x660] sm:$0xff] }
  0x88   :  { %v133_v57 = vld [vmem:[#allocation7 + $0x110] sm:$0xff]  ;;  %v140_v60 = vld [vmem:[#allocation7 + $0x148] sm:$0xff]  ;;  %v1905_v61 = vpack.c.bf16 %v681_v58, %v675_v54  ;;  %v146_v1 = vld [vmem:[#allocation7 + $0x178] sm:$0xff] }
  0x89   :  { %1768 = vmatpush1.bf16.msra.mxu0 %v1767_v24  ;;  %v680_v63 = vld [vmem:[#allocation10 + $0x690] sm:$0xff]  ;;  %v687_v2 = vld [vmem:[#allocation10 + $0x6c8] sm:$0xff]  ;;  %v693_v3 = vld [vmem:[#allocation10 + $0x6f8] sm:$0xff]  ;;  %v1815_v5 = vpack.c.bf16 %v133_v57, %v127_v56  ;;  %v1817_v10 = vpack.c.bf16 %v146_v1, %v140_v60 }
  0x8a   :  { %1800 = vmatpush1.bf16.msra.mxu1 %v1799_v25  ;;  %1770 = vmatprep.subr.bf16.mxu0 %v1769_v26  ;;  %v1907_v4 = vpack.c.bf16 %v680_v63, %v674_v62  ;;  %v139_v6 = vld [vmem:[#allocation7 + $0x140] sm:$0xff]  ;;  %v1909_v7 = vpack.c.bf16 %v693_v3, %v687_v2  ;;  %v692_v9 = vld [vmem:[#allocation10 + $0x6f0] sm:$0xff]  ;;  %v152_v13 = vld [vmem:[#allocation7 + $0x1a8] sm:$0xff] }
  0x8b   :  { %1802 = vmatprep.subr.bf16.mxu1 %v1801_v30  ;;  %v686_v8 = vld [vmem:[#allocation10 + $0x6c0] sm:$0xff]  ;;  %v145_v11 = vld [vmem:[#allocation7 + $0x170] sm:$0xff]  ;;  %v705_v12 = vld [vmem:[#allocation10 + $0x758] sm:$0xff] }
  0x8c   :  { %v158_v14 = vld [vmem:[#allocation7 + $0x1d8] sm:$0xff]  ;;  %v1911_v15 = vpack.c.bf16 %v692_v9, %v686_v8  ;;  %v1819_v16 = vpack.c.bf16 %v145_v11, %v139_v6  ;;  %v151_v17 = vld [vmem:[#allocation7 + $0x1a0] sm:$0xff]  ;;  %v157_v22 = vld [vmem:[#allocation7 + $0x1d0] sm:$0xff] }
  0x8d   :  { %1772 = vmatpush1.bf16.msra.mxu0 %v1771_v34  ;;  %v698_v19 = vld [vmem:[#allocation10 + $0x720] sm:$0xff]  ;;  %v704_v20 = vld [vmem:[#allocation10 + $0x750] sm:$0xff]  ;;  %v1821_v21 = vpack.c.bf16 %v158_v14, %v152_v13  ;;  %v711_v23 = vld [vmem:[#allocation10 + $0x788] sm:$0xff]  ;;  %v1823_v28 = vpack.c.bf16 %v157_v22, %v151_v17 }
  0x8e   :  { %1804 = vmatpush1.bf16.msra.mxu1 %v1803_v35  ;;  %1806 = vmatprep.subr.bf16.mxu0 %v1805_v36  ;;  %v717_v24 = vld [vmem:[#allocation10 + $0x7b8] sm:$0xff]  ;;  %v164_v25 = vld [vmem:[#allocation7 + $0x208] sm:$0xff]  ;;  %v1915_v27 = vpack.c.bf16 %v704_v20, %v698_v19  ;;  %v716_v32 = vld [vmem:[#allocation10 + $0x7b0] sm:$0xff] }
  0x8f   :  { %1902 = vmatprep.subr.bf16.mxu1 %v1901_v50  ;;  %v170_v26 = vld [vmem:[#allocation7 + $0x238] sm:$0xff]  ;;  %v163_v29 = vld [vmem:[#allocation7 + $0x200] sm:$0xff]  ;;  %v1917_v30 = vpack.c.bf16 %v717_v24, %v711_v23  ;;  %v169_v34 = vld [vmem:[#allocation7 + $0x230] sm:$0xff] }
  0x90   :  { %292 = vmatmul.mubr.f32.vlgmr.msra.gmra.mrb[0].mxu0 %v2731_v41  ;;  %v710_v31 = vld [vmem:[#allocation10 + $0x780] sm:$0xff]  ;;  %v1825_v33 = vpack.c.bf16 %v170_v26, %v164_v25  ;;  %v723_v35 = vld [vmem:[#allocation10 + $0x7e8] sm:$0xff]  ;;  %v729_v36 = vld [vmem:[#allocation10 + $0x818] sm:$0xff]  ;;  %v1827_v40 = vpack.c.bf16 %v169_v34, %v163_v29 }
  0x91   :  { %363 = vmatmul.mubr.f32.vlgmr.msra.gmra.mrb[0].mxu1 %v2731_v41  ;;  %1808 = vmatpush1.bf16.msra.mxu0 %v1807_v42  ;;  %v176_v37 = vld [vmem:[#allocation7 + $0x268] sm:$0xff]  ;;  %v182_v38 = vld [vmem:[#allocation7 + $0x298] sm:$0xff]  ;;  %v1919_v39 = vpack.c.bf16 %v716_v32, %v710_v31  ;;  %v175_v42 = vld [vmem:[#allocation7 + $0x260] sm:$0xff]  ;;  %v1921_v43 = vpack.c.bf16 %v729_v36, %v723_v35 }
  0x92   :  { %1810 = vmatprep.subr.bf16.mxu0 %v1809_v45  ;;  %433 = vmatprep.mubr.f32.mxu0 %v2613_v0  ;;  %v699_v0 = vld [vmem:[#allocation10 + $0x728] sm:$0xff]  ;;  %v722_v44 = vld [vmem:[#allocation10 + $0x7e0] sm:$0xff]  ;;  %v728_v45 = vld [vmem:[#allocation10 + $0x810] sm:$0xff]  ;;  %v1829_v46 = vpack.c.bf16 %v182_v38, %v176_v37 }
  0x93   :  { %1904 = vmatpush1.bf16.msra.mxu1 %v1903_v53  ;;  %v1913_v18 = vpack.c.bf16 %v705_v12, %v699_v0  ;;  %v181_v47 = vld [vmem:[#allocation7 + $0x290] sm:$0xff]  ;;  %v741_v49 = vld [vmem:[#allocation10 + $0x878] sm:$0xff]  ;;  %v188_v50 = vld [vmem:[#allocation7 + $0x2c8] sm:$0xff]  ;;  %v1923_v52 = vpack.c.bf16 %v728_v45, %v722_v44 }
  0x94   :  { %1906 = vmatprep.subr.bf16.mxu1 %v1905_v61  ;;  %v735_v48 = vld [vmem:[#allocation10 + $0x848] sm:$0xff]  ;;  %v194_v51 = vld [vmem:[#allocation7 + $0x2f8] sm:$0xff]  ;;  %v1831_v53 = vpack.c.bf16 %v181_v47, %v175_v42  ;;  %v187_v54 = vld [vmem:[#allocation7 + $0x2c0] sm:$0xff] }
  0x95   :  { %1812 = vmatpush1.bf16.msra.mxu0 %v1811_v55  ;;  %v1925_v55 = vpack.c.bf16 %v741_v49, %v735_v48  ;;  %v734_v56 = vld [vmem:[#allocation10 + $0x840] sm:$0xff]  ;;  %v740_v57 = vld [vmem:[#allocation10 + $0x870] sm:$0xff]  ;;  %v1833_v58 = vpack.c.bf16 %v194_v51, %v188_v50  ;;  %v747_v60 = vld [vmem:[#allocation10 + $0x8a8] sm:$0xff] }
  0x96   :  { %1814 = vmatprep.subr.bf16.mxu0 %v1813_v59  ;;  %v193_v59 = vld [vmem:[#allocation7 + $0x2f0] sm:$0xff]  ;;  %v753_v61 = vld [vmem:[#allocation10 + $0x8d8] sm:$0xff]  ;;  %v1927_v1 = vpack.c.bf16 %v740_v57, %v734_v56  ;;  %v470_v3 = vld [vmem:[#allocation10] sm:$0xff] }
  0x97   :  { %1908 = vmatpush1.bf16.msra.mxu1 %v1907_v4  ;;  %v471_v62 = vld [vmem:[#allocation10 + $0x8] sm:$0xff]  ;;  %v477_v63 = vld [vmem:[#allocation10 + $0x38] sm:$0xff]  ;;  %v1835_v2 = vpack.c.bf16 %v193_v59, %v187_v54  ;;  %v1929_v4 = vpack.c.bf16 %v753_v61, %v747_v60  ;;  %v752_v6 = vld [vmem:[#allocation10 + $0x8d0] sm:$0xff] }
  0x98   :  { %1910 = vmatprep.subr.bf16.mxu1 %v1909_v7  ;;  %v1837_v7 = vpack.c.bf16 %v477_v63, %v471_v62  ;;  %v476_v8 = vld [vmem:[#allocation10 + $0x30] sm:$0xff]  ;;  %v759_v9 = vld [vmem:[#allocation10 + $0x908] sm:$0xff]  ;;  %v489_v0 = vld [vmem:[#allocation10 + $0x98] sm:$0xff] }
  0x99   :  { %1816 = vmatpush1.bf16.msra.mxu0 %v1815_v5  ;;  %v746_v5 = vld [vmem:[#allocation10 + $0x8a0] sm:$0xff]  ;;  %v483_v11 = vld [vmem:[#allocation10 + $0x68] sm:$0xff]  ;;  %v1839_v13 = vpack.c.bf16 %v476_v8, %v470_v3  ;;  %v764_v17 = vld [vmem:[#allocation10 + $0x930] sm:$0xff] }
  0x9a   :  { %1818 = vmatprep.subr.bf16.mxu0 %v1817_v10  ;;  %v765_v10 = vld [vmem:[#allocation10 + $0x938] sm:$0xff]  ;;  %v1931_v12 = vpack.c.bf16 %v752_v6, %v746_v5  ;;  %v482_v14 = vld [vmem:[#allocation10 + $0x60] sm:$0xff]  ;;  %v488_v19 = vld [vmem:[#allocation10 + $0x90] sm:$0xff] }
  0x9b   :  { %1912 = vmatpush1.bf16.msra.mxu1 %v1911_v15  ;;  %v1933_v15 = vpack.c.bf16 %v765_v10, %v759_v9  ;;  %v771_v20 = vld [vmem:[#allocation10 + $0x968] sm:$0xff]  ;;  %v501_v23 = vld [vmem:[#allocation10 + $0xf8] sm:$0xff]  ;;  %v1843_v25 = vpack.c.bf16 %v488_v19, %v482_v14  ;;  %v494_v26 = vld [vmem:[#allocation10 + $0xc0] sm:$0xff] }
  0x9c   :  { %1914 = vmatprep.subr.bf16.mxu1 %v1913_v18  ;;  %v1841_v18 = vpack.c.bf16 %v489_v0, %v483_v11  ;;  %v495_v22 = vld [vmem:[#allocation10 + $0xc8] sm:$0xff]  ;;  %v776_v29 = vld [vmem:[#allocation10 + $0x990] sm:$0xff]  ;;  %v513_v35 = vld [vmem:[#allocation10 + $0x158] sm:$0xff] }
  0x9d   :  { %1820 = vmatpush1.bf16.msra.mxu0 %v1819_v16  ;;  %v758_v16 = vld [vmem:[#allocation10 + $0x900] sm:$0xff]  ;;  %v500_v31 = vld [vmem:[#allocation10 + $0xf0] sm:$0xff]  ;;  %v783_v32 = vld [vmem:[#allocation10 + $0x9c8] sm:$0xff] }
  0x9e   :  { %1822 = vmatprep.subr.bf16.mxu0 %v1821_v21  ;;  %v777_v21 = vld [vmem:[#allocation10 + $0x998] sm:$0xff]  ;;  %v1935_v24 = vpack.c.bf16 %v764_v17, %v758_v16  ;;  %v507_v34 = vld [vmem:[#allocation10 + $0x128] sm:$0xff]  ;;  %v506_v37 = vld [vmem:[#allocation10 + $0x120] sm:$0xff] }
  0x9f   :  { %1916 = vmatpush1.bf16.msra.mxu1 %v1915_v27  ;;  %v1937_v27 = vpack.c.bf16 %v777_v21, %v771_v20  ;;  %v1849_v42 = vpack.c.bf16 %v513_v35, %v507_v34  ;;  %v795_v44 = vld [vmem:[#allocation10 + $0xa28] sm:$0xff]  ;;  %v801_v45 = vld [vmem:[#allocation10 + $0xa58] sm:$0xff]  ;;  %v518_v50 = vld [vmem:[#allocation10 + $0x180] sm:$0xff] }
  0xa0   :  { %1918 = vmatprep.subr.bf16.mxu1 %v1917_v30  ;;  %v1845_v30 = vpack.c.bf16 %v501_v23, %v495_v22  ;;  %v525_v47 = vld [vmem:[#allocation10 + $0x1b8] sm:$0xff]  ;;  %v1945_v51 = vpack.c.bf16 %v801_v45, %v795_v44  ;;  %v807_v56 = vld [vmem:[#allocation10 + $0xa88] sm:$0xff]  ;;  %v530_v62 = vld [vmem:[#allocation10 + $0x1e0] sm:$0xff] }
  0xa1   :  { %1824 = vmatpush1.bf16.msra.mxu0 %v1823_v28  ;;  %v770_v28 = vld [vmem:[#allocation10 + $0x960] sm:$0xff]  ;;  %v813_v57 = vld [vmem:[#allocation10 + $0xab8] sm:$0xff]  ;;  %v819_v5 = vld [vmem:[#allocation10 + $0xae8] sm:$0xff] }
  0xa2   :  { %1826 = vmatprep.subr.bf16.mxu0 %v1825_v33  ;;  %v789_v33 = vld [vmem:[#allocation10 + $0x9f8] sm:$0xff]  ;;  %v1939_v36 = vpack.c.bf16 %v776_v29, %v770_v28  ;;  %v1949_v63 = vpack.c.bf16 %v813_v57, %v807_v56  ;;  %v818_v0 = vld [vmem:[#allocation10 + $0xae0] sm:$0xff]  ;;  %v555_v16 = vld [vmem:[#allocation10 + $0x2a8] sm:$0xff] }
  0xa3   :  { %1920 = vmatpush1.bf16.msra.mxu1 %v1919_v39  ;;  %v1941_v38 = vpack.c.bf16 %v789_v33, %v783_v32  ;;  %v782_v39 = vld [vmem:[#allocation10 + $0x9c0] sm:$0xff]  ;;  %v537_v59 = vld [vmem:[#allocation10 + $0x218] sm:$0xff]  ;;  %v560_v22 = vld [vmem:[#allocation10 + $0x2d0] sm:$0xff] }
  0xa4   :  { %1922 = vmatprep.subr.bf16.mxu1 %v1921_v43  ;;  %v512_v43 = vld [vmem:[#allocation10 + $0x150] sm:$0xff]  ;;  %v825_v6 = vld [vmem:[#allocation10 + $0xb18] sm:$0xff]  ;;  %v542_v14 = vld [vmem:[#allocation10 + $0x240] sm:$0xff] }
  0xa5   :  { %1828 = vmatpush1.bf16.msra.mxu0 %v1827_v40  ;;  %v788_v40 = vld [vmem:[#allocation10 + $0x9f0] sm:$0xff]  ;;  %v1851_v49 = vpack.c.bf16 %v512_v43, %v506_v37  ;;  %v549_v8 = vld [vmem:[#allocation10 + $0x278] sm:$0xff]  ;;  %v1953_v11 = vpack.c.bf16 %v825_v6, %v819_v5  ;;  %v554_v21 = vld [vmem:[#allocation10 + $0x2a0] sm:$0xff] }
  0xa6   :  { %1830 = vmatprep.subr.bf16.mxu0 %v1829_v46  ;;  %v519_v46 = vld [vmem:[#allocation10 + $0x188] sm:$0xff]  ;;  %v1943_v48 = vpack.c.bf16 %v788_v40, %v782_v39  ;;  %v561_v17 = vld [vmem:[#allocation10 + $0x2d8] sm:$0xff]  ;;  %v572_v28 = vld [vmem:[#allocation10 + $0x330] sm:$0xff] }
  0xa7   :  { %1924 = vmatpush1.bf16.msra.mxu1 %v1923_v52  ;;  %v794_v52 = vld [vmem:[#allocation10 + $0xa20] sm:$0xff]  ;;  %v1853_v54 = vpack.c.bf16 %v525_v47, %v519_v46  ;;  %v1865_v20 = vpack.c.bf16 %v561_v17, %v555_v16  ;;  %v567_v23 = vld [vmem:[#allocation10 + $0x308] sm:$0xff]  ;;  %v584_v34 = vld [vmem:[#allocation10 + $0x390] sm:$0xff] }
  0xa8   :  { %1926 = vmatprep.subr.bf16.mxu1 %v1925_v55  ;;  %v524_v55 = vld [vmem:[#allocation10 + $0x1b0] sm:$0xff]  ;;  %v579_v29 = vld [vmem:[#allocation10 + $0x368] sm:$0xff]  ;;  %v578_v33 = vld [vmem:[#allocation10 + $0x360] sm:$0xff] }
  0xa9   :  { %1832 = vmatpush1.bf16.msra.mxu0 %v1831_v53  ;;  %v800_v53 = vld [vmem:[#allocation10 + $0xa50] sm:$0xff]  ;;  %v1855_v61 = vpack.c.bf16 %v524_v55, %v518_v50  ;;  %v591_v35 = vld [vmem:[#allocation10 + $0x3c8] sm:$0xff]  ;;  %v602_v45 = vld [vmem:[#allocation10 + $0x420] sm:$0xff] }
  0xaa   :  { %1834 = vmatprep.subr.bf16.mxu0 %v1833_v58  ;;  %v531_v58 = vld [vmem:[#allocation10 + $0x1e8] sm:$0xff]  ;;  %v1947_v60 = vpack.c.bf16 %v800_v53, %v794_v52  ;;  %v596_v39 = vld [vmem:[#allocation10 + $0x3f0] sm:$0xff]  ;;  %v626_v57 = vld [vmem:[#allocation10 + $0x4e0] sm:$0xff] }
  0xab   :  { %1928 = vmatpush1.bf16.msra.mxu1 %v1927_v1  ;;  %v806_v1 = vld [vmem:[#allocation10 + $0xa80] sm:$0xff]  ;;  %v1857_v3 = vpack.c.bf16 %v537_v59, %v531_v58  ;;  %v603_v40 = vld [vmem:[#allocation10 + $0x428] sm:$0xff]  ;;  %v608_v46 = vld [vmem:[#allocation10 + $0x450] sm:$0xff] }
  0xac   :  { %1930 = vmatprep.subr.bf16.mxu1 %v1929_v4  ;;  %v536_v4 = vld [vmem:[#allocation10 + $0x210] sm:$0xff]  ;;  %v615_v47 = vld [vmem:[#allocation10 + $0x488] sm:$0xff]  ;;  %v830_v5 = vld [vmem:[#allocation10 + $0xb40] sm:$0xff] }
  0xad   :  { %1836 = vmatpush1.bf16.msra.mxu0 %v1835_v2  ;;  %v812_v2 = vld [vmem:[#allocation10 + $0xab0] sm:$0xff]  ;;  %v1859_v10 = vpack.c.bf16 %v536_v4, %v530_v62  ;;  %v627_v53 = vld [vmem:[#allocation10 + $0x4e8] sm:$0xff]  ;;  %v842_v16 = vld [vmem:[#allocation10 + $0xba0] sm:$0xff] }
  0xae   :  { %1838 = vmatprep.subr.bf16.mxu0 %v1837_v7  ;;  %v543_v7 = vld [vmem:[#allocation10 + $0x248] sm:$0xff]  ;;  %v1951_v9 = vpack.c.bf16 %v812_v2, %v806_v1  ;;  %v620_v52 = vld [vmem:[#allocation10 + $0x4b0] sm:$0xff]  ;;  %v837_v1 = vld [vmem:[#allocation10 + $0xb78] sm:$0xff] }
  0xaf   :  { %1932 = vmatpush1.bf16.msra.mxu1 %v1931_v12  ;;  %v824_v12 = vld [vmem:[#allocation10 + $0xb10] sm:$0xff]  ;;  %v831_v62 = vld [vmem:[#allocation10 + $0xb48] sm:$0xff]  ;;  %v638_v2 = vld [vmem:[#allocation10 + $0x540] sm:$0xff] }
  0xb0   :  { %434 = vmatmul.mubr.f32.vlgmr.msra.gmra.mrb[2].mxu0 %v2731_v41  ;;  %1934 = vmatprep.subr.bf16.mxu1 %v1933_v15  ;;  %v1847_v41 = vpack.c.bf16 %v500_v31, %v494_v26  ;;  %v548_v15 = vld [vmem:[#allocation10 + $0x270] sm:$0xff]  ;;  %v1957_v4 = vpack.c.bf16 %v837_v1, %v831_v62  ;;  %v873_v1 = vld [vmem:[#allocation10 + $0xc98] sm:$0xff] }
  0xb1   :  { %1840 = vmatpush1.bf16.msra.mxu0 %v1839_v13  ;;  %v1861_v13 = vpack.c.bf16 %v549_v8, %v543_v7  ;;  %v1863_v19 = vpack.c.bf16 %v548_v15, %v542_v14  ;;  %v632_v58 = vld [vmem:[#allocation10 + $0x510] sm:$0xff] }
  0xb2   :  { %1842 = vmatprep.subr.bf16.mxu0 %v1841_v18  ;;  %v1955_v18 = vpack.c.bf16 %v824_v12, %v818_v0  ;;  %v1891_v59 = vpack.c.bf16 %v632_v58, %v626_v57  ;;  %v836_v6 = vld [vmem:[#allocation10 + $0xb70] sm:$0xff]  ;;  %v849_v12 = vld [vmem:[#allocation10 + $0xbd8] sm:$0xff]  ;;  %v491_v58 = vld [vmem:[#allocation10 + $0xa8] sm:$0xff] }
  0xb3   :  { %1936 = vmatpush1.bf16.msra.mxu1 %v1935_v24  ;;  %v573_v24 = vld [vmem:[#allocation10 + $0x338] sm:$0xff]  ;;  %v1959_v8 = vpack.c.bf16 %v836_v6, %v830_v5  ;;  %v656_v14 = vld [vmem:[#allocation10 + $0x5d0] sm:$0xff] }
  0xb4   :  { %1938 = vmatprep.subr.bf16.mxu1 %v1937_v27  ;;  %v1869_v26 = vpack.c.bf16 %v573_v24, %v567_v23  ;;  %v566_v27 = vld [vmem:[#allocation10 + $0x300] sm:$0xff]  ;;  %v848_v17 = vld [vmem:[#allocation10 + $0xbd0] sm:$0xff]  ;;  %v479_v23 = vld [vmem:[#allocation10 + $0x48] sm:$0xff] }
  0xb5   :  { %1844 = vmatpush1.bf16.msra.mxu0 %v1843_v25  ;;  %v1867_v25 = vpack.c.bf16 %v560_v22, %v554_v21  ;;  %v1871_v31 = vpack.c.bf16 %v572_v28, %v566_v27  ;;  %v861_v21 = vld [vmem:[#allocation10 + $0xc38] sm:$0xff] }
  0xb6   :  { %1846 = vmatprep.subr.bf16.mxu0 %v1845_v30  ;;  %v585_v30 = vld [vmem:[#allocation10 + $0x398] sm:$0xff] }
  0xb7   :  { %1940 = vmatpush1.bf16.msra.mxu1 %v1939_v36  ;;  %v1873_v32 = vpack.c.bf16 %v585_v30, %v579_v29  ;;  %v597_v36 = vld [vmem:[#allocation10 + $0x3f8] sm:$0xff] }
  0xb8   :  { %1942 = vmatprep.subr.bf16.mxu1 %v1941_v38  ;;  %v1877_v37 = vpack.c.bf16 %v597_v36, %v591_v35  ;;  %v590_v38 = vld [vmem:[#allocation10 + $0x3c0] sm:$0xff]  ;;  %v473_v22 = vld [vmem:[#allocation10 + $0x18] sm:$0xff] }
  0xb9   :  { %1848 = vmatpush1.bf16.msra.mxu0 %v1847_v41  ;;  %v1875_v41 = vpack.c.bf16 %v584_v34, %v578_v33  ;;  %v1879_v43 = vpack.c.bf16 %v596_v39, %v590_v38  ;;  %v485_v57 = vld [vmem:[#allocation10 + $0x78] sm:$0xff] }
  0xba   :  { %1850 = vmatprep.subr.bf16.mxu0 %v1849_v42  ;;  %v609_v42 = vld [vmem:[#allocation10 + $0x458] sm:$0xff] }
  0xbb   :  { %1944 = vmatpush1.bf16.msra.mxu1 %v1943_v48  ;;  %v1881_v44 = vpack.c.bf16 %v609_v42, %v603_v40  ;;  %v621_v48 = vld [vmem:[#allocation10 + $0x4b8] sm:$0xff]  ;;  %v458_v40 = vld [vmem:[#allocation5] sm:$0xff] }
  0xbc   :  { %1946 = vmatprep.subr.bf16.mxu1 %v1945_v51  ;;  %v1885_v50 = vpack.c.bf16 %v621_v48, %v615_v47  ;;  %v614_v51 = vld [vmem:[#allocation10 + $0x480] sm:$0xff] }
  0xbd   :  { %1852 = vmatpush1.bf16.msra.mxu0 %v1851_v49  ;;  %v1883_v49 = vpack.c.bf16 %v608_v46, %v602_v45  ;;  %v1887_v55 = vpack.c.bf16 %v620_v52, %v614_v51  ;;  %v459_v45 = vld [vmem:[#allocation5 + $0x8] sm:$0xff]  ;;  %v461_v48 = vld [vmem:[#allocation5 + $0x18] sm:$0xff] }
  0xbe   :  { %1854 = vmatprep.subr.bf16.mxu0 %v1853_v54  ;;  %v633_v54 = vld [vmem:[#allocation10 + $0x518] sm:$0xff]  ;;  %v478_v51 = vld [vmem:[#allocation10 + $0x40] sm:$0xff] }
  0xbf   :  { %1948 = vmatpush1.bf16.msra.mxu1 %v1947_v60  ;;  %v1889_v56 = vpack.c.bf16 %v633_v54, %v627_v53  ;;  %v639_v60 = vld [vmem:[#allocation10 + $0x548] sm:$0xff] }
  0xc0   :  { %1950 = vmatprep.subr.bf16.mxu1 %v1949_v63 }
  0xc1   :  { %1856 = vmatpush1.bf16.msra.mxu0 %v1855_v61  ;;  %v645_v61 = vld [vmem:[#allocation10 + $0x578] sm:$0xff] }
  0xc2   :  { %1858 = vmatprep.subr.bf16.mxu0 %v1857_v3  ;;  %v1893_v63 = vpack.c.bf16 %v645_v61, %v639_v60  ;;  %v644_v3 = vld [vmem:[#allocation10 + $0x570] sm:$0xff]  ;;  %v460_v61 = vld [vmem:[#allocation5 + $0x10] sm:$0xff] }
  0xc3   :  { %1952 = vmatpush1.bf16.msra.mxu1 %v1951_v9  ;;  %v1895_v7 = vpack.c.bf16 %v644_v3, %v638_v2  ;;  %v651_v9 = vld [vmem:[#allocation10 + $0x5a8] sm:$0xff] }
  0xc4   :  { %1954 = vmatprep.subr.bf16.mxu1 %v1953_v11  ;;  %v843_v11 = vld [vmem:[#allocation10 + $0xba8] sm:$0xff] }
  0xc5   :  { %1860 = vmatpush1.bf16.msra.mxu0 %v1859_v10  ;;  %v657_v10 = vld [vmem:[#allocation10 + $0x5d8] sm:$0xff]  ;;  %v1961_v15 = vpack.c.bf16 %v849_v12, %v843_v11  ;;  %v872_v12 = vld [vmem:[#allocation10 + $0xc90] sm:$0xff] }
  0xc6   :  { %1862 = vmatprep.subr.bf16.mxu0 %v1861_v13  ;;  %v1897_v0 = vpack.c.bf16 %v657_v10, %v651_v9  ;;  %v650_v13 = vld [vmem:[#allocation10 + $0x5a0] sm:$0xff]  ;;  %v484_v9 = vld [vmem:[#allocation10 + $0x70] sm:$0xff] }
  0xc7   :  { %1956 = vmatpush1.bf16.msra.mxu1 %v1955_v18  ;;  %v1899_v18 = vpack.c.bf16 %v656_v14, %v650_v13  ;;  %v490_v10 = vld [vmem:[#allocation10 + $0xa0] sm:$0xff]  ;;  %v497_v13 = vld [vmem:[#allocation10 + $0xd8] sm:$0xff]  ;;  %v503_v14 = vld [vmem:[#allocation10 + $0x108] sm:$0xff] }
  0xc8   :  { %1958 = vmatprep.subr.bf16.mxu1 %v1957_v4 }
  0xc9   :  { %1864 = vmatpush1.bf16.msra.mxu0 %v1863_v19  ;;  %v1963_v19 = vpack.c.bf16 %v848_v17, %v842_v16  ;;  %v885_v16 = vld [vmem:[#allocation10 + $0xcf8] sm:$0xff]  ;;  %v2035_v17 = vpack.c.bf16 %v490_v10, %v484_v9  ;;  %v927_v9 = vld [vmem:[#allocation10 + $0xe48] sm:$0xff] }
  0xca   :  { %1866 = vmatprep.subr.bf16.mxu0 %v1865_v20  ;;  %v855_v20 = vld [vmem:[#allocation10 + $0xc08] sm:$0xff]  ;;  %v933_v10 = vld [vmem:[#allocation10 + $0xe78] sm:$0xff] }
  0xcb   :  { %1960 = vmatpush1.bf16.msra.mxu1 %v1959_v8  ;;  %v1965_v24 = vpack.c.bf16 %v861_v21, %v855_v20  ;;  %v866_v8 = vld [vmem:[#allocation10 + $0xc60] sm:$0xff]  ;;  %v496_v21 = vld [vmem:[#allocation10 + $0xd0] sm:$0xff] }
  0xcc   :  { %1962 = vmatprep.subr.bf16.mxu1 %v1961_v15  ;;  %v879_v15 = vld [vmem:[#allocation10 + $0xcc8] sm:$0xff]  ;;  %v878_v20 = vld [vmem:[#allocation10 + $0xcc0] sm:$0xff] }
  0xcd   :  { %1868 = vmatpush1.bf16.msra.mxu0 %v1867_v25  ;;  %v2029_v25 = vpack.c.bf16 %v479_v23, %v473_v22  ;;  %v502_v22 = vld [vmem:[#allocation10 + $0x100] sm:$0xff]  ;;  %v1973_v23 = vpack.c.bf16 %v885_v16, %v879_v15  ;;  %v544_v16 = vld [vmem:[#allocation10 + $0x250] sm:$0xff] }
  0xce   :  { %1870 = vmatprep.subr.bf16.mxu0 %v1869_v26  ;;  %v197_v26 = vlaneseq  ;;  %v926_v15 = vld [vmem:[#allocation10 + $0xe40] sm:$0xff] }
  0xcf   :  { %1964 = vmatpush1.bf16.msra.mxu1 %v1963_v19  ;;  %v2037_v19 = vpack.c.bf16 %v503_v14, %v497_v13 }
  0xd0   :  { %1966 = vmatprep.subr.bf16.mxu1 %v1965_v24  ;;  %v2737_v27 = vshrl.u32 %v197_v26, 7  ;;  %v884_v24 = vld [vmem:[#allocation10 + $0xcf0] sm:$0xff]  ;;  %v515_v26 = vld [vmem:[#allocation10 + $0x168] sm:$0xff] }
  0xd1   :  { %1872 = vmatpush1.bf16.msra.mxu0 %v1871_v31  ;;  %v2742_v31 = vld [vmem:[#allocation8] sm:$0x3f] }
  0xd2   :  { %1874 = vmatprep.subr.bf16.mxu0 %v1873_v32  ;;  %v199_v28 = vsub.s32 0, %v2737_v27  ;;  %v207_v29 = vsub.s32 2, %v2737_v27  ;;  %v203_v30 = vsub.s32 1, %v2737_v27  ;;  %v211_v32 = vsub.s32 3, %v2737_v27 }
  0xd4   :  { %v200_v33 = vrot.slane %v2742_v31, %v199_v28  ;;  %v208_v34 = vrot.slane %v2742_v31, %v207_v29  ;;  %v204_v35 = vrot.slane %v2742_v31, %v203_v30  ;;  %v212_v36 = vrot.slane %v2742_v31, %v211_v32 }
  0xd5   :  { %1876 = vmatpush1.bf16.msra.mxu0 %v1875_v41 }
  0xd6   :  { %1878 = vmatprep.subr.bf16.mxu0 %v1877_v37 }
  0xd9   :  { %1880 = vmatpush1.bf16.msra.mxu0 %v1879_v43 }
  0xda   :  { %1882 = vmatprep.subr.bf16.mxu0 %v1881_v44 }
  0xdd   :  { %1884 = vmatpush1.bf16.msra.mxu0 %v1883_v49  ;;  %v854_v49 = vld [vmem:[#allocation10 + $0xc00] sm:$0xff] }
  0xde   :  { %1886 = vmatprep.subr.bf16.mxu0 %v1885_v50  ;;  %v472_v50 = vld [vmem:[#allocation10 + $0x10] sm:$0xff] }
  0xdf   :  { %v2031_v4 = vpack.c.bf16 %v478_v51, %v472_v50  ;;  %v902_v50 = vld [vmem:[#allocation10 + $0xd80] sm:$0xff]  ;;  %v520_v51 = vld [vmem:[#allocation10 + $0x190] sm:$0xff] }
  0xe1   :  { %1888 = vmatpush1.bf16.msra.mxu0 %v1887_v55 }
  0xe2   :  { %1890 = vmatprep.subr.bf16.mxu0 %v1889_v56  ;;  %v860_v56 = vld [vmem:[#allocation10 + $0xc30] sm:$0xff] }
  0xe3   :  { %v1967_v6 = vpack.c.bf16 %v860_v56, %v854_v49  ;;  %v539_v56 = vld [vmem:[#allocation10 + $0x228] sm:$0xff] }
  0xe5   :  { %1892 = vmatpush1.bf16.msra.mxu0 %v1891_v59 }
  0xe6   :  { %1894 = vmatprep.subr.bf16.mxu0 %v1893_v63  ;;  %v867_v63 = vld [vmem:[#allocation10 + $0xc68] sm:$0xff] }
  0xe9   :  { %1896 = vmatpush1.bf16.msra.mxu0 %v1895_v7  ;;  %v2033_v7 = vpack.c.bf16 %v491_v58, %v485_v57  ;;  %v915_v57 = vld [vmem:[#allocation10 + $0xde8] sm:$0xff]  ;;  %v921_v58 = vld [vmem:[#allocation10 + $0xe18] sm:$0xff] }
  0xea   :  { %1898 = vmatprep.subr.bf16.mxu0 %v1897_v0  ;;  %v1969_v0 = vpack.c.bf16 %v873_v1, %v867_v63  ;;  %v914_v63 = vld [vmem:[#allocation10 + $0xde0] sm:$0xff]  ;;  %v532_v1 = vld [vmem:[#allocation10 + $0x1f0] sm:$0xff] }
  0xed   :  { %1900 = vmatpush1.bf16.msra.mxu0 %v1899_v18  ;;  %v1971_v18 = vpack.c.bf16 %v872_v12, %v866_v8  ;;  %v551_v8 = vld [vmem:[#allocation10 + $0x288] sm:$0xff] }
  0xee   :  { %2030 = vmatprep.subr.bf16.mxu0 %v2029_v25  ;;  %v509_v25 = vld [vmem:[#allocation10 + $0x138] sm:$0xff] }
 0x163   :  { %v293_v41 = vpop.f32.mrb[0].mxu0 }
 0x164   :  { %v294_v37 = vadd.f32 %v293_v41, %v200_v33  ;;  %v364_v38 = vpop.f32.mrb[0].mxu1  ;;  %v295_v39 = vpop.f32.mrb[1].mxu0  ;;  %v891_v33 = vld [vmem:[#allocation10 + $0xd28] sm:$0xff]  ;;  %v2041_v41 = vpack.c.bf16 %v515_v26, %v509_v25 }
 0x165   :  { %v365_v42 = vadd.f32 %v364_v38, %v208_v34  ;;  %v296_v43 = vadd.f32 %v295_v39, %v204_v35  ;;  %v366_v44 = vpop.f32.mrb[1].mxu1  ;;  %v897_v34 = vld [vmem:[#allocation10 + $0xd58] sm:$0xff]  ;;  %v2039_v35 = vpack.c.bf16 %v502_v22, %v496_v21  ;;  %v508_v38 = vld [vmem:[#allocation10 + $0x130] sm:$0xff]  ;;  %v514_v39 = vld [vmem:[#allocation10 + $0x160] sm:$0xff] }
 0x166   :  { %vm440_vm0 = vcmp.ge.f32.partialorder %v294_v37, 0.0  ;;  %v446_v46 = vmul.f32 0.2, %v294_v37  ;;  %v367_v47 = vadd.f32 %v366_v44, %v212_v36  ;;  %v1975_v36 = vpack.c.bf16 %v884_v24, %v878_v20  ;;  %v527_v44 = vld [vmem:[#allocation10 + $0x1c8] sm:$0xff]  ;;  %v557_v20 = vld [vmem:[#allocation10 + $0x2b8] sm:$0xff] }
 0x167   :  { %vm442_vm1 = vcmp.ge.f32.partialorder %v365_v42, 0.0  ;;  %v448_v52 = vmul.f32 0.2, %v365_v42  ;;  %vm441_vm2 = vcmp.ge.f32.partialorder %v296_v43, 0.0  ;;  %v447_v53 = vmul.f32 0.2, %v296_v43 }
 0x168   :  { %v452_v54 = vsel %vm440_vm0, %v294_v37, %v446_v46  ;;  %vm443_vm3 = vcmp.ge.f32.partialorder %v367_v47, 0.0  ;;  %v449_v55 = vmul.f32 0.2, %v367_v47  ;;  %v890_v37 = vld [vmem:[#allocation10 + $0xd20] sm:$0xff]  ;;  %v909_v46 = vld [vmem:[#allocation10 + $0xdb8] sm:$0xff]  ;;  %v563_v21 = vld [vmem:[#allocation10 + $0x2e8] sm:$0xff] }
 0x169   :  { %v2757_v59 = vmul.f32 %v458_v40, %v452_v54  ;;  %v454_v60 = vsel %vm442_vm1, %v365_v42, %v448_v52  ;;  %v453_v62 = vsel %vm441_vm2, %v296_v43, %v447_v53  ;;  %v1977_v40 = vpack.c.bf16 %v897_v34, %v891_v33  ;;  %v896_v42 = vld [vmem:[#allocation10 + $0xd50] sm:$0xff]  ;;  %v521_v43 = vld [vmem:[#allocation10 + $0x198] sm:$0xff]  ;;  %v526_v52 = vld [vmem:[#allocation10 + $0x1c0] sm:$0xff] }
 0x16a   :  { %v2759_v2 = vmul.f32 %v459_v45, %v453_v62  ;;  %v455_v3 = vsel %vm443_vm3, %v367_v47, %v449_v55  ;;  %v2763_v11 = vmul.f32 %v460_v61, %v454_v60  ;;  %v903_v45 = vld [vmem:[#allocation10 + $0xd88] sm:$0xff]  ;;  %v2043_v47 = vpack.c.bf16 %v514_v39, %v508_v38  ;;  %v908_v54 = vld [vmem:[#allocation10 + $0xdb0] sm:$0xff]  ;;  %v533_v55 = vld [vmem:[#allocation10 + $0x1f8] sm:$0xff] }
 0x16b   :  { %v2761_v5 = vmul.f32 %v461_v48, %v455_v3  ;;  %v1979_v48 = vpack.c.bf16 %v896_v42, %v890_v37  ;;  %v2045_v49 = vpack.c.bf16 %v527_v44, %v521_v43  ;;  %v1981_v53 = vpack.c.bf16 %v909_v46, %v903_v45  ;;  %v538_v3 = vld [vmem:[#allocation10 + $0x220] sm:$0xff]  ;;  %v939_v22 = vld [vmem:[#allocation10 + $0xea8] sm:$0xff]  ;;  %v944_v38 = vld [vmem:[#allocation10 + $0xed0] sm:$0xff] }
 0x16c   :  { %1142 = vmatprep.mubr.f32.mxu0 %v2759_v2  ;;  %v2047_v60 = vpack.c.bf16 %v526_v52, %v520_v51  ;;  %v1983_v61 = vpack.c.bf16 %v908_v54, %v902_v50  ;;  %v2049_v62 = vpack.c.bf16 %v539_v56, %v533_v55  ;;  %v2051_v12 = vpack.c.bf16 %v538_v3, %v532_v1  ;;  %v938_v34 = vld [vmem:[#allocation10 + $0xea0] sm:$0xff]  ;;  %v569_v39 = vld [vmem:[#allocation10 + $0x318] sm:$0xff]  ;;  %v951_v43 = vld [vmem:[#allocation10 + $0xf08] sm:$0xff] }
 0x16d   :  { %1213 = vmatprep.mubr.f32.mxu1 %v2761_v5  ;;  %1143 = vmatmul.mubr.f32.vlgmr.msra.gmra.mrb[4].mxu0 %v2757_v59  ;;  %v2057_v33 = vpack.c.bf16 %v563_v21, %v557_v20  ;;  %v957_v44 = vld [vmem:[#allocation10 + $0xf38] sm:$0xff]  ;;  %v568_v50 = vld [vmem:[#allocation10 + $0x310] sm:$0xff]  ;;  %v574_v51 = vld [vmem:[#allocation10 + $0x340] sm:$0xff] }
 0x16e   :  { %1214 = vmatmul.mubr.f32.vlgmr.msra.gmra.mrb[2].mxu1 %v2763_v11  ;;  %2032 = vmatpush1.bf16.msra.mxu0 %v2031_v4  ;;  %v1985_v4 = vpack.c.bf16 %v921_v58, %v915_v57  ;;  %v1997_v54 = vpack.c.bf16 %v957_v44, %v951_v43  ;;  %v956_v55 = vld [vmem:[#allocation10 + $0xf30] sm:$0xff]  ;;  %v581_v56 = vld [vmem:[#allocation10 + $0x378] sm:$0xff]  ;;  %v587_v57 = vld [vmem:[#allocation10 + $0x3a8] sm:$0xff] }
 0x16f   :  { %1968 = vmatpush1.bf16.msra.mxu1 %v1967_v6  ;;  %2034 = vmatprep.subr.bf16.mxu0 %v2033_v7  ;;  %v920_v6 = vld [vmem:[#allocation10 + $0xe10] sm:$0xff]  ;;  %v545_v7 = vld [vmem:[#allocation10 + $0x258] sm:$0xff]  ;;  %v963_v58 = vld [vmem:[#allocation10 + $0xf68] sm:$0xff]  ;;  %v2065_v3 = vpack.c.bf16 %v587_v57, %v581_v56  ;;  %v215_v56 = vsub.s32 4, %v2737_v27 }
 0x170   :  { %1970 = vmatprep.subr.bf16.mxu1 %v1969_v0  ;;  %1355 = vmatprep.mubr.f32.mxu0 %v2759_v2  ;;  %v219_v0 = vsub.s32 5, %v2737_v27  ;;  %v1987_v13 = vpack.c.bf16 %v920_v6, %v914_v63  ;;  %v2053_v14 = vpack.c.bf16 %v551_v8, %v545_v7  ;;  %v580_v6 = vld [vmem:[#allocation10 + $0x370] sm:$0xff]  ;;  %v586_v7 = vld [vmem:[#allocation10 + $0x3a0] sm:$0xff]  ;;  %v623_v43 = vld [vmem:[#allocation10 + $0x4c8] sm:$0xff] }
 0x171   :  { %v598_v20 = vld [vmem:[#allocation10 + $0x400] sm:$0xff]  ;;  %v999_v44 = vld [vmem:[#allocation10 + $0x1088] sm:$0xff] }
 0x172   :  { %2036 = vmatpush1.bf16.msra.mxu0 %v2035_v17  ;;  %v550_v17 = vld [vmem:[#allocation10 + $0x280] sm:$0xff]  ;;  %v220_v24 = vrot.slane %v2742_v31, %v219_v0  ;;  %v1011_v57 = vld [vmem:[#allocation10 + $0x10e8] sm:$0xff] }
 0x173   :  { %1972 = vmatpush1.bf16.msra.mxu1 %v1971_v18  ;;  %2038 = vmatprep.subr.bf16.mxu0 %v2037_v19  ;;  %v1989_v18 = vpack.c.bf16 %v933_v10, %v927_v9  ;;  %v932_v19 = vld [vmem:[#allocation10 + $0xe70] sm:$0xff]  ;;  %v2055_v25 = vpack.c.bf16 %v550_v17, %v544_v16  ;;  %v593_v10 = vld [vmem:[#allocation10 + $0x3d8] sm:$0xff] }
 0x174   :  { %1974 = vmatprep.subr.bf16.mxu1 %v1973_v23  ;;  %v945_v23 = vld [vmem:[#allocation10 + $0xed8] sm:$0xff]  ;;  %v1991_v26 = vpack.c.bf16 %v932_v19, %v926_v15  ;;  %v968_v9 = vld [vmem:[#allocation10 + $0xf90] sm:$0xff]  ;;  %v2067_v15 = vpack.c.bf16 %v586_v7, %v580_v6 }
 0x175   :  { %v1993_v37 = vpack.c.bf16 %v945_v23, %v939_v22  ;;  %v592_v19 = vld [vmem:[#allocation10 + $0x3d0] sm:$0xff]  ;;  %v605_v23 = vld [vmem:[#allocation10 + $0x438] sm:$0xff] }
 0x176   :  { %2040 = vmatpush1.bf16.msra.mxu0 %v2039_v35  ;;  %v556_v35 = vld [vmem:[#allocation10 + $0x2b0] sm:$0xff] }
 0x177   :  { %1976 = vmatpush1.bf16.msra.mxu1 %v1975_v36  ;;  %2042 = vmatprep.subr.bf16.mxu0 %v2041_v41  ;;  %v562_v36 = vld [vmem:[#allocation10 + $0x2e0] sm:$0xff]  ;;  %v980_v22 = vld [vmem:[#allocation10 + $0xff0] sm:$0xff] }
 0x178   :  { %1978 = vmatprep.subr.bf16.mxu1 %v1977_v40  ;;  %v575_v40 = vld [vmem:[#allocation10 + $0x348] sm:$0xff]  ;;  %v2059_v46 = vpack.c.bf16 %v562_v36, %v556_v35  ;;  %v986_v36 = vld [vmem:[#allocation10 + $0x1020] sm:$0xff]  ;;  %v1016_v7 = vld [vmem:[#allocation10 + $0x1110] sm:$0xff] }
 0x17a   :  { %2044 = vmatpush1.bf16.msra.mxu0 %v2043_v47  ;;  %v950_v47 = vld [vmem:[#allocation10 + $0xf00] sm:$0xff] }
 0x17b   :  { %1980 = vmatpush1.bf16.msra.mxu1 %v1979_v48  ;;  %2046 = vmatprep.subr.bf16.mxu0 %v2045_v49  ;;  %v1995_v48 = vpack.c.bf16 %v944_v38, %v938_v34  ;;  %v2061_v49 = vpack.c.bf16 %v575_v40, %v569_v39  ;;  %v1999_v1 = vpack.c.bf16 %v956_v55, %v950_v47  ;;  %v610_v38 = vld [vmem:[#allocation10 + $0x460] sm:$0xff]  ;;  %v992_v40 = vld [vmem:[#allocation10 + $0x1050] sm:$0xff]  ;;  %v635_v55 = vld [vmem:[#allocation10 + $0x528] sm:$0xff] }
 0x17c   :  { %1982 = vmatprep.subr.bf16.mxu1 %v1981_v53  ;;  %v463_v53 = vld [vmem:[#allocation5 + $0x28] sm:$0xff]  ;;  %v2011_v47 = vpack.c.bf16 %v992_v40, %v986_v36 }
 0x17d   :  { %v652_v36 = vld [vmem:[#allocation10 + $0x5b0] sm:$0xff]  ;;  %v665_v40 = vld [vmem:[#allocation10 + $0x618] sm:$0xff] }
 0x17e   :  { %2048 = vmatpush1.bf16.msra.mxu0 %v2047_v60  ;;  %v969_v60 = vld [vmem:[#allocation10 + $0xf98] sm:$0xff] }
 0x17f   :  { %1984 = vmatpush1.bf16.msra.mxu1 %v1983_v61  ;;  %2050 = vmatprep.subr.bf16.mxu0 %v2049_v62  ;;  %v2063_v62 = vpack.c.bf16 %v574_v51, %v568_v50  ;;  %v2001_v8 = vpack.c.bf16 %v969_v60, %v963_v58  ;;  %v616_v50 = vld [vmem:[#allocation10 + $0x490] sm:$0xff]  ;;  %v622_v51 = vld [vmem:[#allocation10 + $0x4c0] sm:$0xff]  ;;  %v1017_v58 = vld [vmem:[#allocation10 + $0x1118] sm:$0xff] }
 0x180   :  { %1986 = vmatprep.subr.bf16.mxu1 %v1985_v4  ;;  %v962_v4 = vld [vmem:[#allocation10 + $0xf60] sm:$0xff]  ;;  %v2079_v60 = vpack.c.bf16 %v622_v51, %v616_v50  ;;  %v2017_v6 = vpack.c.bf16 %v1017_v58, %v1011_v57  ;;  %v683_v57 = vld [vmem:[#allocation10 + $0x6a8] sm:$0xff] }
 0x181   :  { %v2003_v16 = vpack.c.bf16 %v968_v9, %v962_v4  ;;  %v634_v4 = vld [vmem:[#allocation10 + $0x520] sm:$0xff]  ;;  %v647_v9 = vld [vmem:[#allocation10 + $0x588] sm:$0xff] }
 0x182   :  { %2052 = vmatpush1.bf16.msra.mxu0 %v2051_v12  ;;  %v599_v12 = vld [vmem:[#allocation10 + $0x408] sm:$0xff]  ;;  %v474_v51 = vld [vmem:[#allocation10 + $0x20] sm:$0xff] }
 0x183   :  { %1988 = vmatpush1.bf16.msra.mxu1 %v1987_v13  ;;  %2054 = vmatprep.subr.bf16.mxu0 %v2053_v14  ;;  %v2774_v41 = vpop.f32.mrb[2].mxu0  ;;  %v975_v13 = vld [vmem:[#allocation10 + $0xfc8] sm:$0xff]  ;;  %v981_v14 = vld [vmem:[#allocation10 + $0xff8] sm:$0xff]  ;;  %v2069_v17 = vpack.c.bf16 %v599_v12, %v593_v10  ;;  %v216_v10 = vrot.slane %v2742_v31, %v215_v56 }
 0x184   :  { %1990 = vmatprep.subr.bf16.mxu1 %v1989_v18  ;;  %v437_v42 = vpop.f32.mrb[3].mxu0  ;;  %v974_v18 = vld [vmem:[#allocation10 + $0xfc0] sm:$0xff]  ;;  %v2005_v21 = vpack.c.bf16 %v981_v14, %v975_v13  ;;  %v1023_v12 = vld [vmem:[#allocation10 + $0x1148] sm:$0xff]  ;;  %v1029_v13 = vld [vmem:[#allocation10 + $0x1178] sm:$0xff] }
 0x185   :  { %v438_v45 = vadd.f32 %v437_v42, %v220_v24  ;;  %v611_v24 = vld [vmem:[#allocation10 + $0x468] sm:$0xff]  ;;  %v2007_v34 = vpack.c.bf16 %v980_v22, %v974_v18  ;;  %v617_v42 = vld [vmem:[#allocation10 + $0x498] sm:$0xff]  ;;  %v640_v18 = vld [vmem:[#allocation10 + $0x550] sm:$0xff] }
 0x186   :  { %2056 = vmatpush1.bf16.msra.mxu0 %v2055_v25  ;;  %v987_v25 = vld [vmem:[#allocation10 + $0x1028] sm:$0xff]  ;;  %v2073_v35 = vpack.c.bf16 %v611_v24, %v605_v23  ;;  %v653_v22 = vld [vmem:[#allocation10 + $0x5b8] sm:$0xff]  ;;  %v436_v24 = vadd.f32 %v2774_v41, %v216_v10 }
 0x187   :  { %1992 = vmatpush1.bf16.msra.mxu1 %v1991_v26  ;;  %2058 = vmatprep.subr.bf16.mxu0 %v2057_v33  ;;  %vm445_vm4 = vcmp.ge.f32.partialorder %v438_v45, 0.0  ;;  %v451_v52 = vmul.f32 0.2, %v438_v45  ;;  %v993_v26 = vld [vmem:[#allocation10 + $0x1058] sm:$0xff]  ;;  %v2071_v33 = vpack.c.bf16 %v598_v20, %v592_v19  ;;  %v646_v19 = vld [vmem:[#allocation10 + $0x580] sm:$0xff]  ;;  %v2021_v20 = vpack.c.bf16 %v1029_v13, %v1023_v12  ;;  %v659_v23 = vld [vmem:[#allocation10 + $0x5e8] sm:$0xff] }
 0x188   :  { %1994 = vmatprep.subr.bf16.mxu1 %v1993_v37  ;;  %v604_v37 = vld [vmem:[#allocation10 + $0x430] sm:$0xff]  ;;  %v2009_v39 = vpack.c.bf16 %v993_v26, %v987_v25  ;;  %v1035_v25 = vld [vmem:[#allocation10 + $0x11a8] sm:$0xff]  ;;  %v1041_v31 = vld [vmem:[#allocation10 + $0x11d8] sm:$0xff]  ;;  %v2087_v26 = vpack.c.bf16 %v646_v19, %v640_v18  ;;  %vm444_vm5 = vcmp.ge.f32.partialorder %v436_v24, 0.0 }
 0x189   :  { %v457_v61 = vsel %vm445_vm4, %v438_v45, %v451_v52  ;;  %v1005_v45 = vld [vmem:[#allocation10 + $0x10b8] sm:$0xff]  ;;  %v695_v10 = vld [vmem:[#allocation10 + $0x708] sm:$0xff]  ;;  %v688_v18 = vld [vmem:[#allocation10 + $0x6d0] sm:$0xff] }
 0x18a   :  { %2060 = vmatpush1.bf16.msra.mxu0 %v2059_v46  ;;  %v2776_v63 = vmul.f32 %v463_v53, %v457_v61  ;;  %v2075_v46 = vpack.c.bf16 %v610_v38, %v604_v37  ;;  %v2013_v52 = vpack.c.bf16 %v1005_v45, %v999_v44  ;;  %v1004_v53 = vld [vmem:[#allocation10 + $0x10b0] sm:$0xff]  ;;  %v658_v37 = vld [vmem:[#allocation10 + $0x5e0] sm:$0xff]  ;;  %v2025_v38 = vpack.c.bf16 %v1041_v31, %v1035_v25  ;;  %v475_v44 = vld [vmem:[#allocation10 + $0x28] sm:$0xff] }
 0x18b   :  { %1996 = vmatpush1.bf16.msra.mxu1 %v1995_v48  ;;  %2062 = vmatprep.subr.bf16.mxu0 %v2061_v49  ;;  %v2077_v48 = vpack.c.bf16 %v623_v43, %v617_v42  ;;  %v998_v49 = vld [vmem:[#allocation10 + $0x1080] sm:$0xff]  ;;  %v671_v42 = vld [vmem:[#allocation10 + $0x648] sm:$0xff]  ;;  %v450_v43 = vmul.f32 0.2, %v436_v24  ;;  %v481_v45 = vld [vmem:[#allocation10 + $0x58] sm:$0xff]  ;;  %v2091_v41 = vpack.c.bf16 %v658_v37, %v652_v36 }
 0x18c   :  { %1998 = vmatprep.subr.bf16.mxu1 %v1997_v54  ;;  %1284 = vmatprep.mubr.f32.mxu1 %v2776_v63  ;;  %v629_v54 = vld [vmem:[#allocation10 + $0x4f8] sm:$0xff]  ;;  %v2015_v61 = vpack.c.bf16 %v1004_v53, %v998_v49  ;;  %v670_v49 = vld [vmem:[#allocation10 + $0x640] sm:$0xff]  ;;  %v2221_v50 = vpack.c.bf16 %v481_v45, %v475_v44  ;;  %v499_v13 = vld [vmem:[#allocation10 + $0xe8] sm:$0xff] }
 0x18d   :  { %v456_v53 = vsel %vm444_vm5, %v436_v24, %v450_v43  ;;  %v694_v19 = vld [vmem:[#allocation10 + $0x700] sm:$0xff]  ;;  %v707_v24 = vld [vmem:[#allocation10 + $0x768] sm:$0xff]  ;;  %v517_v31 = vld [vmem:[#allocation10 + $0x178] sm:$0xff] }
 0x18e   :  { %2064 = vmatpush1.bf16.msra.mxu0 %v2063_v62  ;;  %v2081_v62 = vpack.c.bf16 %v635_v55, %v629_v54  ;;  %v462_v54 = vld [vmem:[#allocation5 + $0x20] sm:$0xff]  ;;  %v677_v55 = vld [vmem:[#allocation10 + $0x678] sm:$0xff]  ;;  %v706_v36 = vld [vmem:[#allocation10 + $0x760] sm:$0xff] }
 0x18f   :  { %2000 = vmatpush1.bf16.msra.mxu1 %v1999_v1  ;;  %2066 = vmatprep.subr.bf16.mxu0 %v2065_v3  ;;  %v1010_v1 = vld [vmem:[#allocation10 + $0x10e0] sm:$0xff]  ;;  %v628_v3 = vld [vmem:[#allocation10 + $0x4f0] sm:$0xff]  ;;  %v511_v25 = vld [vmem:[#allocation10 + $0x148] sm:$0xff] }
 0x190   :  { %2002 = vmatprep.subr.bf16.mxu1 %v2001_v8  ;;  %v641_v8 = vld [vmem:[#allocation10 + $0x558] sm:$0xff]  ;;  %v2083_v14 = vpack.c.bf16 %v634_v4, %v628_v3  ;;  %v682_v3 = vld [vmem:[#allocation10 + $0x6a0] sm:$0xff] }
 0x191   :  { %v486_v4 = vld [vmem:[#allocation10 + $0x80] sm:$0xff]  ;;  %v529_v43 = vld [vmem:[#allocation10 + $0x1d8] sm:$0xff] }
 0x192   :  { %2068 = vmatpush1.bf16.msra.mxu0 %v2067_v15  ;;  %v2019_v15 = vpack.c.bf16 %v1016_v7, %v1010_v1  ;;  %v676_v1 = vld [vmem:[#allocation10 + $0x670] sm:$0xff]  ;;  %v2097_v7 = vpack.c.bf16 %v683_v57, %v677_v55  ;;  %v510_v37 = vld [vmem:[#allocation10 + $0x140] sm:$0xff] }
 0x193   :  { %2004 = vmatpush1.bf16.msra.mxu1 %v2003_v16  ;;  %2070 = vmatprep.subr.bf16.mxu0 %v2069_v17  ;;  %v2085_v16 = vpack.c.bf16 %v647_v9, %v641_v8  ;;  %v1022_v17 = vld [vmem:[#allocation10 + $0x1140] sm:$0xff]  ;;  %v492_v8 = vld [vmem:[#allocation10 + $0xb0] sm:$0xff]  ;;  %v689_v9 = vld [vmem:[#allocation10 + $0x6d8] sm:$0xff] }
 0x194   :  { %2006 = vmatprep.subr.bf16.mxu1 %v2005_v21  ;;  %v1028_v21 = vld [vmem:[#allocation10 + $0x1170] sm:$0xff] }
 0x196   :  { %2072 = vmatpush1.bf16.msra.mxu0 %v2071_v33  ;;  %v2023_v33 = vpack.c.bf16 %v1028_v21, %v1022_v17  ;;  %v2101_v17 = vpack.c.bf16 %v695_v10, %v689_v9  ;;  %v553_v9 = vld [vmem:[#allocation10 + $0x298] sm:$0xff] }
 0x197   :  { %2008 = vmatpush1.bf16.msra.mxu1 %v2007_v34  ;;  %2074 = vmatprep.subr.bf16.mxu0 %v2073_v35  ;;  %v2089_v34 = vpack.c.bf16 %v659_v23, %v653_v22  ;;  %v1034_v35 = vld [vmem:[#allocation10 + $0x11a0] sm:$0xff]  ;;  %v504_v22 = vld [vmem:[#allocation10 + $0x110] sm:$0xff]  ;;  %v701_v23 = vld [vmem:[#allocation10 + $0x738] sm:$0xff] }
 0x198   :  { %2010 = vmatprep.subr.bf16.mxu1 %v2009_v39  ;;  %v1040_v39 = vld [vmem:[#allocation10 + $0x11d0] sm:$0xff] }
 0x19a   :  { %2076 = vmatpush1.bf16.msra.mxu0 %v2075_v46  ;;  %v2027_v46 = vpack.c.bf16 %v1040_v39, %v1034_v35  ;;  %v700_v35 = vld [vmem:[#allocation10 + $0x730] sm:$0xff]  ;;  %v713_v39 = vld [vmem:[#allocation10 + $0x798] sm:$0xff] }
 0x19b   :  { %2012 = vmatpush1.bf16.msra.mxu1 %v2011_v47  ;;  %2078 = vmatprep.subr.bf16.mxu0 %v2077_v48  ;;  %v2093_v47 = vpack.c.bf16 %v671_v42, %v665_v40  ;;  %v664_v48 = vld [vmem:[#allocation10 + $0x610] sm:$0xff]  ;;  %v719_v40 = vld [vmem:[#allocation10 + $0x7c8] sm:$0xff]  ;;  %v2107_v44 = vpack.c.bf16 %v706_v36, %v700_v35  ;;  %v761_v36 = vld [vmem:[#allocation10 + $0x918] sm:$0xff] }
 0x19c   :  { %2014 = vmatprep.subr.bf16.mxu1 %v2013_v52  ;;  %v480_v52 = vld [vmem:[#allocation10 + $0x50] sm:$0xff]  ;;  %v2095_v58 = vpack.c.bf16 %v670_v49, %v664_v48  ;;  %v523_v42 = vld [vmem:[#allocation10 + $0x1a8] sm:$0xff]  ;;  %v522_v48 = vld [vmem:[#allocation10 + $0x1a0] sm:$0xff] }
 0x19d   :  { %v2237_v49 = vpack.c.bf16 %v529_v43, %v523_v42  ;;  %v564_v35 = vld [vmem:[#allocation10 + $0x2f0] sm:$0xff] }
 0x19e   :  { %2080 = vmatpush1.bf16.msra.mxu0 %v2079_v60  ;;  %v487_v60 = vld [vmem:[#allocation10 + $0x88] sm:$0xff]  ;;  %v760_v43 = vld [vmem:[#allocation10 + $0x910] sm:$0xff] }
 0x19f   :  { %2016 = vmatpush1.bf16.msra.mxu1 %v2015_v61  ;;  %2082 = vmatprep.subr.bf16.mxu0 %v2081_v62  ;;  %v493_v61 = vld [vmem:[#allocation10 + $0xb8] sm:$0xff]  ;;  %v2223_v62 = vpack.c.bf16 %v480_v52, %v474_v51  ;;  %v731_v52 = vld [vmem:[#allocation10 + $0x828] sm:$0xff] }
 0x1a0   :  { %2018 = vmatprep.subr.bf16.mxu1 %v2017_v6  ;;  %v2784_v6 = vmul.f32 %v462_v54, %v456_v53  ;;  %v2225_v12 = vpack.c.bf16 %v493_v61, %v487_v60  ;;  %v725_v51 = vld [vmem:[#allocation10 + $0x7f8] sm:$0xff]  ;;  %v535_v53 = vld [vmem:[#allocation10 + $0x208] sm:$0xff]  ;;  %v724_v60 = vld [vmem:[#allocation10 + $0x7f0] sm:$0xff] }
 0x1a1   :  { %v541_v54 = vld [vmem:[#allocation10 + $0x238] sm:$0xff]  ;;  %v730_v61 = vld [vmem:[#allocation10 + $0x820] sm:$0xff] }
 0x1a2   :  { %2084 = vmatpush1.bf16.msra.mxu0 %v2083_v14  ;;  %v505_v14 = vld [vmem:[#allocation10 + $0x118] sm:$0xff]  ;;  %v2115_v10 = vpack.c.bf16 %v730_v61, %v724_v60  ;;  %v588_v60 = vld [vmem:[#allocation10 + $0x3b0] sm:$0xff] }
 0x1a3   :  { %2020 = vmatpush1.bf16.msra.mxu1 %v2019_v15  ;;  %2086 = vmatprep.subr.bf16.mxu0 %v2085_v16  ;;  %v2099_v15 = vpack.c.bf16 %v682_v3, %v676_v1  ;;  %v2227_v16 = vpack.c.bf16 %v492_v8, %v486_v4  ;;  %v2229_v21 = vpack.c.bf16 %v505_v14, %v499_v13  ;;  %v540_v3 = vld [vmem:[#allocation10 + $0x230] sm:$0xff]  ;;  %v737_v4 = vld [vmem:[#allocation10 + $0x858] sm:$0xff]  ;;  %v547_v8 = vld [vmem:[#allocation10 + $0x268] sm:$0xff] }
 0x1a4   :  { %2022 = vmatprep.subr.bf16.mxu1 %v2021_v20  ;;  %v498_v20 = vld [vmem:[#allocation10 + $0xe0] sm:$0xff]  ;;  %v2241_v1 = vpack.c.bf16 %v541_v54, %v535_v53  ;;  %v736_v14 = vld [vmem:[#allocation10 + $0x850] sm:$0xff]  ;;  %v785_v61 = vld [vmem:[#allocation10 + $0x9d8] sm:$0xff] }
 0x1a5   :  { %v772_v54 = vld [vmem:[#allocation10 + $0x970] sm:$0xff] }
 0x1a6   :  { %2088 = vmatpush1.bf16.msra.mxu0 %v2087_v26  ;;  %v2103_v26 = vpack.c.bf16 %v694_v19, %v688_v18  ;;  %v552_v18 = vld [vmem:[#allocation10 + $0x290] sm:$0xff]  ;;  %v749_v19 = vld [vmem:[#allocation10 + $0x8b8] sm:$0xff] }
 0x1a7   :  { %2024 = vmatpush1.bf16.msra.mxu1 %v2023_v33  ;;  %2090 = vmatprep.subr.bf16.mxu0 %v2089_v34  ;;  %v2231_v33 = vpack.c.bf16 %v504_v22, %v498_v20  ;;  %v2105_v34 = vpack.c.bf16 %v707_v24, %v701_v23  ;;  %v755_v20 = vld [vmem:[#allocation10 + $0x8e8] sm:$0xff]  ;;  %v565_v22 = vld [vmem:[#allocation10 + $0x2f8] sm:$0xff] }
 0x1a8   :  { %2026 = vmatprep.subr.bf16.mxu1 %v2025_v38  ;;  %v2233_v38 = vpack.c.bf16 %v517_v31, %v511_v25  ;;  %v2121_v25 = vpack.c.bf16 %v755_v20, %v749_v19  ;;  %v748_v31 = vld [vmem:[#allocation10 + $0x8b0] sm:$0xff] }
 0x1aa   :  { %2092 = vmatpush1.bf16.msra.mxu0 %v2091_v41  ;;  %v2109_v41 = vpack.c.bf16 %v719_v40, %v713_v39 }
 0x1ab   :  { %2028 = vmatpush1.bf16.msra.mxu1 %v2027_v46  ;;  %2094 = vmatprep.subr.bf16.mxu0 %v2093_v47  ;;  %v712_v46 = vld [vmem:[#allocation10 + $0x790] sm:$0xff]  ;;  %v718_v47 = vld [vmem:[#allocation10 + $0x7c0] sm:$0xff] }
 0x1ac   :  { %2222 = vmatprep.subr.bf16.mxu1 %v2221_v50  ;;  %v528_v50 = vld [vmem:[#allocation10 + $0x1d0] sm:$0xff]  ;;  %v2111_v55 = vpack.c.bf16 %v718_v47, %v712_v46  ;;  %v773_v47 = vld [vmem:[#allocation10 + $0x978] sm:$0xff] }
 0x1ad   :  { %1356 = vmatmul.mubr.f32.vlgmr.msra.gmra.mrb[6].mxu0 %v2757_v59  ;;  %v2239_v57 = vpack.c.bf16 %v528_v50, %v522_v48  ;;  %v576_v46 = vld [vmem:[#allocation10 + $0x350] sm:$0xff]  ;;  %v779_v48 = vld [vmem:[#allocation10 + $0x9a8] sm:$0xff]  ;;  %v589_v50 = vld [vmem:[#allocation10 + $0x3b8] sm:$0xff] }
 0x1ae   :  { %1285 = vmatmul.mubr.f32.vlgmr.msra.gmra.mrb[2].mxu1 %v2784_v6  ;;  %2096 = vmatpush1.bf16.msra.mxu0 %v2095_v58  ;;  %v2113_v58 = vpack.c.bf16 %v731_v52, %v725_v51  ;;  %v2129_v53 = vpack.c.bf16 %v779_v48, %v773_v47 }
 0x1af   :  { %1426 = vmatprep.mubr.f32.mxu0 %v2761_v5  ;;  %2224 = vmatpush1.bf16.msra.mxu1 %v2223_v62  ;;  %v534_v62 = vld [vmem:[#allocation10 + $0x200] sm:$0xff] }
 0x1b0   :  { %1568 = vmatprep.mubr.f32.mxu1 %v2759_v2  ;;  %2098 = vmatprep.subr.bf16.mxu0 %v2097_v7  ;;  %v516_v2 = vld [vmem:[#allocation10 + $0x170] sm:$0xff]  ;;  %v743_v7 = vld [vmem:[#allocation10 + $0x888] sm:$0xff] }
 0x1b1   :  { %2226 = vmatprep.subr.bf16.mxu1 %v2225_v12  ;;  %v2235_v45 = vpack.c.bf16 %v516_v2, %v510_v37  ;;  %v2243_v12 = vpack.c.bf16 %v540_v3, %v534_v62  ;;  %v2117_v13 = vpack.c.bf16 %v743_v7, %v737_v4  ;;  %v767_v37 = vld [vmem:[#allocation10 + $0x948] sm:$0xff]  ;;  %v577_v2 = vld [vmem:[#allocation10 + $0x358] sm:$0xff] }
 0x1b2   :  { %2100 = vmatpush1.bf16.msra.mxu0 %v2099_v15  ;;  %v742_v15 = vld [vmem:[#allocation10 + $0x880] sm:$0xff]  ;;  %v2125_v42 = vpack.c.bf16 %v767_v37, %v761_v36  ;;  %v791_v62 = vld [vmem:[#allocation10 + $0xa08] sm:$0xff]  ;;  %v601_v3 = vld [vmem:[#allocation10 + $0x418] sm:$0xff] }
 0x1b3   :  { %2228 = vmatpush1.bf16.msra.mxu1 %v2227_v16  ;;  %2102 = vmatprep.subr.bf16.mxu0 %v2101_v17  ;;  %v546_v16 = vld [vmem:[#allocation10 + $0x260] sm:$0xff]  ;;  %v2245_v17 = vpack.c.bf16 %v553_v9, %v547_v8  ;;  %v2119_v23 = vpack.c.bf16 %v742_v15, %v736_v14  ;;  %v2133_v8 = vpack.c.bf16 %v791_v62, %v785_v61  ;;  %v784_v9 = vld [vmem:[#allocation10 + $0x9d0] sm:$0xff]  ;;  %v797_v15 = vld [vmem:[#allocation10 + $0xa38] sm:$0xff] }
 0x1b4   :  { %2230 = vmatprep.subr.bf16.mxu1 %v2229_v21  ;;  %v559_v21 = vld [vmem:[#allocation10 + $0x2c8] sm:$0xff]  ;;  %v2247_v24 = vpack.c.bf16 %v552_v18, %v546_v16  ;;  %v600_v14 = vld [vmem:[#allocation10 + $0x410] sm:$0xff]  ;;  %v613_v18 = vld [vmem:[#allocation10 + $0x478] sm:$0xff] }
 0x1b5   :  { %v803_v16 = vld [vmem:[#allocation10 + $0xa68] sm:$0xff] }
 0x1b6   :  { %2104 = vmatpush1.bf16.msra.mxu0 %v2103_v26  ;;  %v754_v26 = vld [vmem:[#allocation10 + $0x8e0] sm:$0xff] }
 0x1b7   :  { %2232 = vmatpush1.bf16.msra.mxu1 %v2231_v33  ;;  %2106 = vmatprep.subr.bf16.mxu0 %v2105_v34  ;;  %v558_v33 = vld [vmem:[#allocation10 + $0x2c0] sm:$0xff]  ;;  %v2249_v34 = vpack.c.bf16 %v565_v22, %v559_v21  ;;  %v2123_v39 = vpack.c.bf16 %v754_v26, %v748_v31  ;;  %v2137_v21 = vpack.c.bf16 %v803_v16, %v797_v15  ;;  %v796_v22 = vld [vmem:[#allocation10 + $0xa30] sm:$0xff]  ;;  %v809_v26 = vld [vmem:[#allocation10 + $0xa98] sm:$0xff] }
 0x1b8   :  { %2234 = vmatprep.subr.bf16.mxu1 %v2233_v38  ;;  %v571_v38 = vld [vmem:[#allocation10 + $0x328] sm:$0xff]  ;;  %v2251_v40 = vpack.c.bf16 %v564_v35, %v558_v33  ;;  %v612_v31 = vld [vmem:[#allocation10 + $0x470] sm:$0xff]  ;;  %v625_v35 = vld [vmem:[#allocation10 + $0x4d8] sm:$0xff] }
 0x1b9   :  { %v815_v33 = vld [vmem:[#allocation10 + $0xac8] sm:$0xff] }
 0x1ba   :  { %2108 = vmatpush1.bf16.msra.mxu0 %v2107_v44  ;;  %v766_v44 = vld [vmem:[#allocation10 + $0x940] sm:$0xff] }
 0x1bb   :  { %2236 = vmatpush1.bf16.msra.mxu1 %v2235_v45  ;;  %2110 = vmatprep.subr.bf16.mxu0 %v2109_v41  ;;  %v570_v45 = vld [vmem:[#allocation10 + $0x320] sm:$0xff]  ;;  %v2253_v41 = vpack.c.bf16 %v577_v2, %v571_v38  ;;  %v2127_v51 = vpack.c.bf16 %v766_v44, %v760_v43  ;;  %v2141_v38 = vpack.c.bf16 %v815_v33, %v809_v26  ;;  %v808_v2 = vld [vmem:[#allocation10 + $0xa90] sm:$0xff]  ;;  %v821_v44 = vld [vmem:[#allocation10 + $0xaf8] sm:$0xff] }
 0x1bc   :  { %2238 = vmatprep.subr.bf16.mxu1 %v2237_v49  ;;  %v583_v49 = vld [vmem:[#allocation10 + $0x388] sm:$0xff]  ;;  %v2255_v52 = vpack.c.bf16 %v576_v46, %v570_v45  ;;  %v624_v43 = vld [vmem:[#allocation10 + $0x4d0] sm:$0xff]  ;;  %v637_v46 = vld [vmem:[#allocation10 + $0x538] sm:$0xff] }
 0x1bd   :  { %v827_v45 = vld [vmem:[#allocation10 + $0xb28] sm:$0xff] }
 0x1be   :  { %2112 = vmatpush1.bf16.msra.mxu0 %v2111_v55  ;;  %v778_v55 = vld [vmem:[#allocation10 + $0x9a0] sm:$0xff] }
 0x1bf   :  { %2240 = vmatpush1.bf16.msra.mxu1 %v2239_v57  ;;  %2114 = vmatprep.subr.bf16.mxu0 %v2113_v58  ;;  %v582_v57 = vld [vmem:[#allocation10 + $0x380] sm:$0xff]  ;;  %v2257_v58 = vpack.c.bf16 %v589_v50, %v583_v49  ;;  %v2131_v4 = vpack.c.bf16 %v778_v55, %v772_v54  ;;  %v2145_v49 = vpack.c.bf16 %v827_v45, %v821_v44  ;;  %v820_v50 = vld [vmem:[#allocation10 + $0xaf0] sm:$0xff]  ;;  %v833_v55 = vld [vmem:[#allocation10 + $0xb58] sm:$0xff] }
 0x1c0   :  { %2242 = vmatprep.subr.bf16.mxu1 %v2241_v1  ;;  %v595_v1 = vld [vmem:[#allocation10 + $0x3e8] sm:$0xff]  ;;  %v2259_v7 = vpack.c.bf16 %v588_v60, %v582_v57  ;;  %v636_v54 = vld [vmem:[#allocation10 + $0x530] sm:$0xff]  ;;  %v649_v60 = vld [vmem:[#allocation10 + $0x598] sm:$0xff] }
 0x1c1   :  { %v839_v57 = vld [vmem:[#allocation10 + $0xb88] sm:$0xff]  ;;  %v685_v44 = vld [vmem:[#allocation10 + $0x6b8] sm:$0xff] }
 0x1c2   :  { %2116 = vmatpush1.bf16.msra.mxu0 %v2115_v10  ;;  %v790_v10 = vld [vmem:[#allocation10 + $0xa00] sm:$0xff] }
 0x1c3   :  { %2244 = vmatpush1.bf16.msra.mxu1 %v2243_v12  ;;  %2118 = vmatprep.subr.bf16.mxu0 %v2117_v13  ;;  %v594_v12 = vld [vmem:[#allocation10 + $0x3e0] sm:$0xff]  ;;  %v2261_v13 = vpack.c.bf16 %v601_v3, %v595_v1  ;;  %v2135_v19 = vpack.c.bf16 %v790_v10, %v784_v9  ;;  %v2149_v1 = vpack.c.bf16 %v839_v57, %v833_v55  ;;  %v832_v3 = vld [vmem:[#allocation10 + $0xb50] sm:$0xff]  ;;  %v845_v10 = vld [vmem:[#allocation10 + $0xbb8] sm:$0xff] }
 0x1c4   :  { %2246 = vmatprep.subr.bf16.mxu1 %v2245_v17  ;;  %v607_v17 = vld [vmem:[#allocation10 + $0x448] sm:$0xff]  ;;  %v2263_v20 = vpack.c.bf16 %v600_v14, %v594_v12  ;;  %v648_v9 = vld [vmem:[#allocation10 + $0x590] sm:$0xff]  ;;  %v661_v14 = vld [vmem:[#allocation10 + $0x5f8] sm:$0xff] }
 0x1c5   :  { %v851_v12 = vld [vmem:[#allocation10 + $0xbe8] sm:$0xff] }
 0x1c6   :  { %2120 = vmatpush1.bf16.msra.mxu0 %v2119_v23  ;;  %v802_v23 = vld [vmem:[#allocation10 + $0xa60] sm:$0xff] }
 0x1c7   :  { %2248 = vmatpush1.bf16.msra.mxu1 %v2247_v24  ;;  %2122 = vmatprep.subr.bf16.mxu0 %v2121_v25  ;;  %v606_v24 = vld [vmem:[#allocation10 + $0x440] sm:$0xff]  ;;  %v2265_v25 = vpack.c.bf16 %v613_v18, %v607_v17  ;;  %v2139_v36 = vpack.c.bf16 %v802_v23, %v796_v22  ;;  %v2153_v17 = vpack.c.bf16 %v851_v12, %v845_v10  ;;  %v844_v18 = vld [vmem:[#allocation10 + $0xbb0] sm:$0xff]  ;;  %v857_v23 = vld [vmem:[#allocation10 + $0xc18] sm:$0xff] }
 0x1c8   :  { %2250 = vmatprep.subr.bf16.mxu1 %v2249_v34  ;;  %v619_v34 = vld [vmem:[#allocation10 + $0x4a8] sm:$0xff]  ;;  %v2267_v37 = vpack.c.bf16 %v612_v31, %v606_v24  ;;  %v660_v22 = vld [vmem:[#allocation10 + $0x5f0] sm:$0xff]  ;;  %v673_v31 = vld [vmem:[#allocation10 + $0x658] sm:$0xff] }
 0x1c9   :  { %v863_v24 = vld [vmem:[#allocation10 + $0xc48] sm:$0xff] }
 0x1ca   :  { %2124 = vmatpush1.bf16.msra.mxu0 %v2123_v39  ;;  %v814_v39 = vld [vmem:[#allocation10 + $0xac0] sm:$0xff] }
 0x1cb   :  { %2252 = vmatpush1.bf16.msra.mxu1 %v2251_v40  ;;  %2126 = vmatprep.subr.bf16.mxu0 %v2125_v42  ;;  %v618_v40 = vld [vmem:[#allocation10 + $0x4a0] sm:$0xff]  ;;  %v2269_v42 = vpack.c.bf16 %v625_v35, %v619_v34  ;;  %v2143_v47 = vpack.c.bf16 %v814_v39, %v808_v2  ;;  %v2157_v34 = vpack.c.bf16 %v863_v24, %v857_v23  ;;  %v856_v35 = vld [vmem:[#allocation10 + $0xc10] sm:$0xff]  ;;  %v869_v39 = vld [vmem:[#allocation10 + $0xc78] sm:$0xff] }
 0x1cc   :  { %2254 = vmatprep.subr.bf16.mxu1 %v2253_v41  ;;  %v631_v41 = vld [vmem:[#allocation10 + $0x508] sm:$0xff]  ;;  %v2271_v48 = vpack.c.bf16 %v624_v43, %v618_v40  ;;  %v672_v2 = vld [vmem:[#allocation10 + $0x650] sm:$0xff] }
 0x1cd   :  { %v875_v40 = vld [vmem:[#allocation10 + $0xca8] sm:$0xff]  ;;  %v904_v24 = vld [vmem:[#allocation10 + $0xd90] sm:$0xff] }
 0x1ce   :  { %2128 = vmatpush1.bf16.msra.mxu0 %v2127_v51  ;;  %v826_v51 = vld [vmem:[#allocation10 + $0xb20] sm:$0xff]  ;;  %v679_v43 = vld [vmem:[#allocation10 + $0x688] sm:$0xff] }
 0x1cf   :  { %2256 = vmatpush1.bf16.msra.mxu1 %v2255_v52  ;;  %2130 = vmatprep.subr.bf16.mxu0 %v2129_v53  ;;  %v630_v52 = vld [vmem:[#allocation10 + $0x500] sm:$0xff]  ;;  %v2273_v53 = vpack.c.bf16 %v637_v46, %v631_v41  ;;  %v2147_v61 = vpack.c.bf16 %v826_v51, %v820_v50  ;;  %v868_v41 = vld [vmem:[#allocation10 + $0xc70] sm:$0xff]  ;;  %v881_v50 = vld [vmem:[#allocation10 + $0xcd8] sm:$0xff] }
 0x1d0   :  { %2258 = vmatprep.subr.bf16.mxu1 %v2257_v58  ;;  %v643_v58 = vld [vmem:[#allocation10 + $0x568] sm:$0xff]  ;;  %v2275_v62 = vpack.c.bf16 %v636_v54, %v630_v52  ;;  %v874_v46 = vld [vmem:[#allocation10 + $0xca0] sm:$0xff]  ;;  %v2289_v52 = vpack.c.bf16 %v685_v44, %v679_v43  ;;  %v697_v54 = vld [vmem:[#allocation10 + $0x718] sm:$0xff] }
 0x1d1   :  { %v887_v51 = vld [vmem:[#allocation10 + $0xd08] sm:$0xff]  ;;  %v2163_v55 = vpack.c.bf16 %v874_v46, %v868_v41  ;;  %v726_v43 = vld [vmem:[#allocation10 + $0x800] sm:$0xff]  ;;  %v929_v41 = vld [vmem:[#allocation10 + $0xe58] sm:$0xff] }
 0x1d2   :  { %2132 = vmatpush1.bf16.msra.mxu0 %v2131_v4  ;;  %v838_v4 = vld [vmem:[#allocation10 + $0xb80] sm:$0xff]  ;;  %v935_v46 = vld [vmem:[#allocation10 + $0xe88] sm:$0xff] }
 0x1d3   :  { %2260 = vmatpush1.bf16.msra.mxu1 %v2259_v7  ;;  %2134 = vmatprep.subr.bf16.mxu0 %v2133_v8  ;;  %v642_v7 = vld [vmem:[#allocation10 + $0x560] sm:$0xff]  ;;  %v2277_v8 = vpack.c.bf16 %v649_v60, %v643_v58  ;;  %v2151_v15 = vpack.c.bf16 %v838_v4, %v832_v3  ;;  %v2165_v58 = vpack.c.bf16 %v887_v51, %v881_v50  ;;  %v880_v60 = vld [vmem:[#allocation10 + $0xcd0] sm:$0xff]  ;;  %v893_v4 = vld [vmem:[#allocation10 + $0xd38] sm:$0xff] }
 0x1d4   :  { %2262 = vmatprep.subr.bf16.mxu1 %v2261_v13  ;;  %v655_v13 = vld [vmem:[#allocation10 + $0x5c8] sm:$0xff]  ;;  %v2279_v16 = vpack.c.bf16 %v648_v9, %v642_v7  ;;  %v696_v3 = vld [vmem:[#allocation10 + $0x710] sm:$0xff]  ;;  %v2181_v51 = vpack.c.bf16 %v935_v46, %v929_v41 }
 0x1d5   :  { %v899_v7 = vld [vmem:[#allocation10 + $0xd68] sm:$0xff]  ;;  %v976_v46 = vld [vmem:[#allocation10 + $0xfd0] sm:$0xff] }
 0x1d6   :  { %2136 = vmatpush1.bf16.msra.mxu0 %v2135_v19  ;;  %v850_v19 = vld [vmem:[#allocation10 + $0xbe0] sm:$0xff]  ;;  %v2169_v12 = vpack.c.bf16 %v899_v7, %v893_v4  ;;  %v940_v7 = vld [vmem:[#allocation10 + $0xeb0] sm:$0xff] }
 0x1d7   :  { %2264 = vmatpush1.bf16.msra.mxu1 %v2263_v20  ;;  %2138 = vmatprep.subr.bf16.mxu0 %v2137_v21  ;;  %v654_v20 = vld [vmem:[#allocation10 + $0x5c0] sm:$0xff]  ;;  %v2281_v21 = vpack.c.bf16 %v661_v14, %v655_v13  ;;  %v2155_v26 = vpack.c.bf16 %v850_v19, %v844_v18  ;;  %v892_v13 = vld [vmem:[#allocation10 + $0xd30] sm:$0xff]  ;;  %v911_v18 = vld [vmem:[#allocation10 + $0xdc8] sm:$0xff] }
 0x1d8   :  { %2266 = vmatprep.subr.bf16.mxu1 %v2265_v25  ;;  %v667_v25 = vld [vmem:[#allocation10 + $0x628] sm:$0xff]  ;;  %v2283_v33 = vpack.c.bf16 %v660_v22, %v654_v20  ;;  %v898_v14 = vld [vmem:[#allocation10 + $0xd60] sm:$0xff]  ;;  %v721_v20 = vld [vmem:[#allocation10 + $0x7d8] sm:$0xff] }
 0x1d9   :  { %v715_v19 = vld [vmem:[#allocation10 + $0x7a8] sm:$0xff] }
 0x1da   :  { %2140 = vmatpush1.bf16.msra.mxu0 %v2139_v36  ;;  %v862_v36 = vld [vmem:[#allocation10 + $0xc40] sm:$0xff] }
 0x1db   :  { %2268 = vmatpush1.bf16.msra.mxu1 %v2267_v37  ;;  %2142 = vmatprep.subr.bf16.mxu0 %v2141_v38  ;;  %v2285_v37 = vpack.c.bf16 %v673_v31, %v667_v25  ;;  %v666_v38 = vld [vmem:[#allocation10 + $0x620] sm:$0xff] }
 0x1dc   :  { %2270 = vmatprep.subr.bf16.mxu1 %v2269_v42  ;;  %v2159_v42 = vpack.c.bf16 %v862_v36, %v856_v35  ;;  %v2287_v45 = vpack.c.bf16 %v672_v2, %v666_v38  ;;  %v910_v25 = vld [vmem:[#allocation10 + $0xdc0] sm:$0xff]  ;;  %v923_v35 = vld [vmem:[#allocation10 + $0xe28] sm:$0xff] }
 0x1dd   :  { %v714_v31 = vld [vmem:[#allocation10 + $0x7a0] sm:$0xff]  ;;  %v727_v36 = vld [vmem:[#allocation10 + $0x808] sm:$0xff]  ;;  %v2175_v38 = vpack.c.bf16 %v910_v25, %v904_v24 }
 0x1de   :  { %2144 = vmatpush1.bf16.msra.mxu0 %v2143_v47  ;;  %v678_v47 = vld [vmem:[#allocation10 + $0x680] sm:$0xff]  ;;  %v971_v24 = vld [vmem:[#allocation10 + $0xfa8] sm:$0xff] }
 0x1df   :  { %2272 = vmatpush1.bf16.msra.mxu1 %v2271_v48  ;;  %2146 = vmatprep.subr.bf16.mxu0 %v2145_v49  ;;  %v2161_v48 = vpack.c.bf16 %v875_v40, %v869_v39  ;;  %v684_v49 = vld [vmem:[#allocation10 + $0x6b0] sm:$0xff]  ;;  %v775_v25 = vld [vmem:[#allocation10 + $0x988] sm:$0xff] }
 0x1e0   :  { %2274 = vmatprep.subr.bf16.mxu1 %v2273_v53  ;;  %v691_v53 = vld [vmem:[#allocation10 + $0x6e8] sm:$0xff]  ;;  %v2291_v57 = vpack.c.bf16 %v684_v49, %v678_v47  ;;  %v916_v40 = vld [vmem:[#allocation10 + $0xdf0] sm:$0xff] }
 0x1e1   :  { %v739_v47 = vld [vmem:[#allocation10 + $0x868] sm:$0xff] }
 0x1e2   :  { %2148 = vmatpush1.bf16.msra.mxu0 %v2147_v61  ;;  %v886_v61 = vld [vmem:[#allocation10 + $0xd00] sm:$0xff] }
 0x1e3   :  { %2276 = vmatpush1.bf16.msra.mxu1 %v2275_v62  ;;  %2150 = vmatprep.subr.bf16.mxu0 %v2149_v1  ;;  %v690_v62 = vld [vmem:[#allocation10 + $0x6e0] sm:$0xff]  ;;  %v2293_v1 = vpack.c.bf16 %v697_v54, %v691_v53  ;;  %v2167_v9 = vpack.c.bf16 %v886_v61, %v880_v60  ;;  %v947_v60 = vld [vmem:[#allocation10 + $0xee8] sm:$0xff] }
 0x1e4   :  { %2278 = vmatprep.subr.bf16.mxu1 %v2277_v8  ;;  %v703_v8 = vld [vmem:[#allocation10 + $0x748] sm:$0xff]  ;;  %v2295_v10 = vpack.c.bf16 %v696_v3, %v690_v62  ;;  %v934_v53 = vld [vmem:[#allocation10 + $0xe80] sm:$0xff]  ;;  %v757_v62 = vld [vmem:[#allocation10 + $0x8f8] sm:$0xff] }
 0x1e5   :  { %v738_v54 = vld [vmem:[#allocation10 + $0x860] sm:$0xff]  ;;  %v751_v61 = vld [vmem:[#allocation10 + $0x8c8] sm:$0xff] }
 0x1e6   :  { %2152 = vmatpush1.bf16.msra.mxu0 %v2151_v15  ;;  %v702_v15 = vld [vmem:[#allocation10 + $0x740] sm:$0xff] }
 0x1e7   :  { %2280 = vmatpush1.bf16.msra.mxu1 %v2279_v16  ;;  %2154 = vmatprep.subr.bf16.mxu0 %v2153_v17  ;;  %v905_v17 = vld [vmem:[#allocation10 + $0xd98] sm:$0xff] }
 0x1e8   :  { %2282 = vmatprep.subr.bf16.mxu1 %v2281_v21  ;;  %v2171_v21 = vpack.c.bf16 %v898_v14, %v892_v13  ;;  %v2173_v23 = vpack.c.bf16 %v911_v18, %v905_v17  ;;  %v959_v13 = vld [vmem:[#allocation10 + $0xf48] sm:$0xff]  ;;  %v952_v18 = vld [vmem:[#allocation10 + $0xf10] sm:$0xff] }
 0x1e9   :  { %v763_v14 = vld [vmem:[#allocation10 + $0x928] sm:$0xff] }
 0x1ea   :  { %2156 = vmatpush1.bf16.msra.mxu0 %v2155_v26  ;;  %v2301_v26 = vpack.c.bf16 %v721_v20, %v715_v19  ;;  %v958_v19 = vld [vmem:[#allocation10 + $0xf40] sm:$0xff] }
 0x1eb   :  { %2284 = vmatpush1.bf16.msra.mxu1 %v2283_v33  ;;  %2158 = vmatprep.subr.bf16.mxu0 %v2157_v34  ;;  %v720_v33 = vld [vmem:[#allocation10 + $0x7d0] sm:$0xff]  ;;  %v917_v34 = vld [vmem:[#allocation10 + $0xdf8] sm:$0xff]  ;;  %v762_v20 = vld [vmem:[#allocation10 + $0x920] sm:$0xff] }
 0x1ec   :  { %2286 = vmatprep.subr.bf16.mxu1 %v2285_v37  ;;  %v733_v37 = vld [vmem:[#allocation10 + $0x838] sm:$0xff]  ;;  %v2303_v2 = vpack.c.bf16 %v720_v33, %v714_v31  ;;  %v2177_v39 = vpack.c.bf16 %v923_v35, %v917_v34  ;;  %v964_v35 = vld [vmem:[#allocation10 + $0xf70] sm:$0xff] }
 0x1ed   :  { %1427 = vmatmul.mubr.f32.vlgmr.msra.gmra.mrb[6].mxu0 %v2763_v11  ;;  %v2305_v44 = vpack.c.bf16 %v733_v37, %v727_v36  ;;  %v781_v31 = vld [vmem:[#allocation10 + $0x9b8] sm:$0xff]  ;;  %v970_v36 = vld [vmem:[#allocation10 + $0xfa0] sm:$0xff] }
 0x1ee   :  { %1569 = vmatmul.mubr.f32.vlgmr.msra.gmra.mrb[4].mxu1 %v2757_v59  ;;  %2160 = vmatpush1.bf16.msra.mxu0 %v2159_v42  ;;  %v709_v59 = vld [vmem:[#allocation10 + $0x778] sm:$0xff]  ;;  %v922_v42 = vld [vmem:[#allocation10 + $0xe20] sm:$0xff] }
 0x1ef   :  { %1497 = vmatprep.mubr.f32.mxu0 %v2776_v63  ;;  %2288 = vmatpush1.bf16.msra.mxu1 %v2287_v45  ;;  %v2297_v16 = vpack.c.bf16 %v709_v59, %v703_v8  ;;  %v732_v45 = vld [vmem:[#allocation10 + $0x830] sm:$0xff]  ;;  %v2179_v49 = vpack.c.bf16 %v922_v42, %v916_v40  ;;  %v946_v8 = vld [vmem:[#allocation10 + $0xee0] sm:$0xff]  ;;  %v983_v40 = vld [vmem:[#allocation10 + $0x1008] sm:$0xff] }
 0x1f0   :  { %1639 = vmatprep.mubr.f32.mxu1 %v2761_v5  ;;  %2162 = vmatprep.subr.bf16.mxu0 %v2161_v48  ;;  %v708_v5 = vld [vmem:[#allocation10 + $0x770] sm:$0xff]  ;;  %v745_v48 = vld [vmem:[#allocation10 + $0x898] sm:$0xff]  ;;  %v2307_v50 = vpack.c.bf16 %v732_v45, %v726_v43  ;;  %v750_v59 = vld [vmem:[#allocation10 + $0x8c0] sm:$0xff] }
 0x1f1   :  { %2290 = vmatprep.subr.bf16.mxu1 %v2289_v52  ;;  %v2299_v22 = vpack.c.bf16 %v708_v5, %v702_v15  ;;  %v928_v52 = vld [vmem:[#allocation10 + $0xe50] sm:$0xff]  ;;  %v769_v15 = vld [vmem:[#allocation10 + $0x958] sm:$0xff]  ;;  %v774_v37 = vld [vmem:[#allocation10 + $0x980] sm:$0xff] }
 0x1f2   :  { %2164 = vmatpush1.bf16.msra.mxu0 %v2163_v55  ;;  %v2309_v55 = vpack.c.bf16 %v745_v48, %v739_v47  ;;  %v787_v42 = vld [vmem:[#allocation10 + $0x9e8] sm:$0xff]  ;;  %v793_v43 = vld [vmem:[#allocation10 + $0xa18] sm:$0xff]  ;;  %v982_v47 = vld [vmem:[#allocation10 + $0x1000] sm:$0xff] }
 0x1f3   :  { %2292 = vmatpush1.bf16.msra.mxu1 %v2291_v57  ;;  %2166 = vmatprep.subr.bf16.mxu0 %v2165_v58  ;;  %v744_v57 = vld [vmem:[#allocation10 + $0x890] sm:$0xff]  ;;  %v941_v58 = vld [vmem:[#allocation10 + $0xeb8] sm:$0xff]  ;;  %v786_v48 = vld [vmem:[#allocation10 + $0x9e0] sm:$0xff] }
 0x1f4   :  { %2294 = vmatprep.subr.bf16.mxu1 %v2293_v1  ;;  %v2183_v1 = vpack.c.bf16 %v934_v53, %v928_v52  ;;  %v2311_v3 = vpack.c.bf16 %v744_v57, %v738_v54  ;;  %v2185_v4 = vpack.c.bf16 %v947_v60, %v941_v58  ;;  %v995_v52 = vld [vmem:[#allocation10 + $0x1068] sm:$0xff]  ;;  %v805_v54 = vld [vmem:[#allocation10 + $0xa78] sm:$0xff]  ;;  %v988_v60 = vld [vmem:[#allocation10 + $0x1030] sm:$0xff] }
 0x1f5   :  { %v799_v53 = vld [vmem:[#allocation10 + $0xa48] sm:$0xff] }
 0x1f6   :  { %2168 = vmatpush1.bf16.msra.mxu0 %v2167_v9  ;;  %v2313_v9 = vpack.c.bf16 %v757_v62, %v751_v61  ;;  %v994_v61 = vld [vmem:[#allocation10 + $0x1060] sm:$0xff] }
 0x1f7   :  { %2296 = vmatpush1.bf16.msra.mxu1 %v2295_v10  ;;  %2170 = vmatprep.subr.bf16.mxu0 %v2169_v12  ;;  %v756_v10 = vld [vmem:[#allocation10 + $0x8f0] sm:$0xff]  ;;  %v953_v12 = vld [vmem:[#allocation10 + $0xf18] sm:$0xff]  ;;  %v798_v62 = vld [vmem:[#allocation10 + $0xa40] sm:$0xff] }
 0x1f8   :  { %2298 = vmatprep.subr.bf16.mxu1 %v2297_v16  ;;  %v2187_v16 = vpack.c.bf16 %v946_v8, %v940_v7  ;;  %v2315_v5 = vpack.c.bf16 %v756_v10, %v750_v59  ;;  %v2189_v17 = vpack.c.bf16 %v959_v13, %v953_v12  ;;  %v1007_v7 = vld [vmem:[#allocation10 + $0x10c8] sm:$0xff]  ;;  %v817_v59 = vld [vmem:[#allocation10 + $0xad8] sm:$0xff]  ;;  %v1000_v13 = vld [vmem:[#allocation10 + $0x1090] sm:$0xff] }
 0x1f9   :  { %v811_v8 = vld [vmem:[#allocation10 + $0xaa8] sm:$0xff] }
 0x1fa   :  { %2172 = vmatpush1.bf16.msra.mxu0 %v2171_v21  ;;  %v2317_v21 = vpack.c.bf16 %v769_v15, %v763_v14  ;;  %v1006_v14 = vld [vmem:[#allocation10 + $0x10c0] sm:$0xff] }
 0x1fb   :  { %2300 = vmatpush1.bf16.msra.mxu1 %v2299_v22  ;;  %2174 = vmatprep.subr.bf16.mxu0 %v2173_v23  ;;  %v768_v22 = vld [vmem:[#allocation10 + $0x950] sm:$0xff]  ;;  %v965_v23 = vld [vmem:[#allocation10 + $0xf78] sm:$0xff]  ;;  %v810_v15 = vld [vmem:[#allocation10 + $0xaa0] sm:$0xff] }
 0x1fc   :  { %2302 = vmatprep.subr.bf16.mxu1 %v2301_v26  ;;  %v2191_v26 = vpack.c.bf16 %v958_v19, %v952_v18  ;;  %v2319_v33 = vpack.c.bf16 %v768_v22, %v762_v20  ;;  %v2193_v34 = vpack.c.bf16 %v971_v24, %v965_v23  ;;  %v1019_v18 = vld [vmem:[#allocation10 + $0x1128] sm:$0xff]  ;;  %v829_v20 = vld [vmem:[#allocation10 + $0xb38] sm:$0xff]  ;;  %v1012_v24 = vld [vmem:[#allocation10 + $0x10f0] sm:$0xff] }
 0x1fd   :  { %v823_v19 = vld [vmem:[#allocation10 + $0xb08] sm:$0xff] }
 0x1fe   :  { %2176 = vmatpush1.bf16.msra.mxu0 %v2175_v38  ;;  %v2321_v38 = vpack.c.bf16 %v781_v31, %v775_v25  ;;  %v1018_v25 = vld [vmem:[#allocation10 + $0x1120] sm:$0xff] }
 0x1ff   :  { %2304 = vmatpush1.bf16.msra.mxu1 %v2303_v2  ;;  %2178 = vmatprep.subr.bf16.mxu0 %v2177_v39  ;;  %v780_v2 = vld [vmem:[#allocation10 + $0x9b0] sm:$0xff]  ;;  %v977_v39 = vld [vmem:[#allocation10 + $0xfd8] sm:$0xff]  ;;  %v822_v31 = vld [vmem:[#allocation10 + $0xb00] sm:$0xff] }
 0x200   :  { %2306 = vmatprep.subr.bf16.mxu1 %v2305_v44  ;;  %v2195_v44 = vpack.c.bf16 %v970_v36, %v964_v35  ;;  %v2323_v45 = vpack.c.bf16 %v780_v2, %v774_v37  ;;  %v2197_v41 = vpack.c.bf16 %v983_v40, %v977_v39  ;;  %v1031_v35 = vld [vmem:[#allocation10 + $0x1188] sm:$0xff]  ;;  %v841_v37 = vld [vmem:[#allocation10 + $0xb98] sm:$0xff]  ;;  %v1024_v40 = vld [vmem:[#allocation10 + $0x1150] sm:$0xff] }
 0x201   :  { %v835_v36 = vld [vmem:[#allocation10 + $0xb68] sm:$0xff] }
 0x202   :  { %2180 = vmatpush1.bf16.msra.mxu0 %v2179_v49  ;;  %v2325_v49 = vpack.c.bf16 %v793_v43, %v787_v42  ;;  %v1030_v42 = vld [vmem:[#allocation10 + $0x1180] sm:$0xff] }
 0x203   :  { %2308 = vmatpush1.bf16.msra.mxu1 %v2307_v50  ;;  %2182 = vmatprep.subr.bf16.mxu0 %v2181_v51  ;;  %v792_v50 = vld [vmem:[#allocation10 + $0xa10] sm:$0xff]  ;;  %v989_v51 = vld [vmem:[#allocation10 + $0x1038] sm:$0xff]  ;;  %v834_v43 = vld [vmem:[#allocation10 + $0xb60] sm:$0xff] }
 0x204   :  { %2310 = vmatprep.subr.bf16.mxu1 %v2309_v55  ;;  %v2199_v55 = vpack.c.bf16 %v982_v47, %v976_v46  ;;  %v2327_v57 = vpack.c.bf16 %v792_v50, %v786_v48  ;;  %v2201_v58 = vpack.c.bf16 %v995_v52, %v989_v51  ;;  %v1043_v46 = vld [vmem:[#allocation10 + $0x11e8] sm:$0xff]  ;;  %v853_v48 = vld [vmem:[#allocation10 + $0xbf8] sm:$0xff]  ;;  %v1036_v52 = vld [vmem:[#allocation10 + $0x11b0] sm:$0xff] }
 0x205   :  { %v847_v47 = vld [vmem:[#allocation10 + $0xbc8] sm:$0xff] }
 0x206   :  { %2184 = vmatpush1.bf16.msra.mxu0 %v2183_v1  ;;  %v2329_v1 = vpack.c.bf16 %v805_v54, %v799_v53  ;;  %v1042_v53 = vld [vmem:[#allocation10 + $0x11e0] sm:$0xff]  ;;  %v2345_v54 = vpack.c.bf16 %v853_v48, %v847_v47 }
 0x207   :  { %2312 = vmatpush1.bf16.msra.mxu1 %v2311_v3  ;;  %2186 = vmatprep.subr.bf16.mxu0 %v2185_v4  ;;  %v804_v3 = vld [vmem:[#allocation10 + $0xa70] sm:$0xff]  ;;  %v1001_v4 = vld [vmem:[#allocation10 + $0x1098] sm:$0xff] }
 0x208   :  { %2314 = vmatprep.subr.bf16.mxu1 %v2313_v9  ;;  %v2203_v9 = vpack.c.bf16 %v994_v61, %v988_v60  ;;  %v2331_v10 = vpack.c.bf16 %v804_v3, %v798_v62  ;;  %v2205_v12 = vpack.c.bf16 %v1007_v7, %v1001_v4  ;;  %v865_v60 = vld [vmem:[#allocation10 + $0xc58] sm:$0xff]  ;;  %v2219_v61 = vpack.c.bf16 %v1042_v53, %v1036_v52  ;;  %v858_v3 = vld [vmem:[#allocation10 + $0xc20] sm:$0xff]  ;;  %v864_v4 = vld [vmem:[#allocation10 + $0xc50] sm:$0xff] }
 0x209   :  { %v871_v7 = vld [vmem:[#allocation10 + $0xc88] sm:$0xff]  ;;  %v961_v53 = vld [vmem:[#allocation10 + $0xf58] sm:$0xff] }
 0x20a   :  { %2188 = vmatpush1.bf16.msra.mxu0 %v2187_v16  ;;  %v2333_v16 = vpack.c.bf16 %v817_v59, %v811_v8  ;;  %v877_v8 = vld [vmem:[#allocation10 + $0xcb8] sm:$0xff]  ;;  %v2351_v59 = vpack.c.bf16 %v864_v4, %v858_v3  ;;  %v955_v52 = vld [vmem:[#allocation10 + $0xf28] sm:$0xff]  ;;  %v966_v3 = vld [vmem:[#allocation10 + $0xf80] sm:$0xff] }
 0x20b   :  { %2316 = vmatpush1.bf16.msra.mxu1 %v2315_v5  ;;  %2190 = vmatprep.subr.bf16.mxu0 %v2189_v17  ;;  %v816_v5 = vld [vmem:[#allocation10 + $0xad0] sm:$0xff]  ;;  %v1013_v17 = vld [vmem:[#allocation10 + $0x10f8] sm:$0xff] }
 0x20c   :  { %2318 = vmatprep.subr.bf16.mxu1 %v2317_v21  ;;  %v2207_v21 = vpack.c.bf16 %v1006_v14, %v1000_v13  ;;  %v2335_v22 = vpack.c.bf16 %v816_v5, %v810_v15  ;;  %v2209_v23 = vpack.c.bf16 %v1019_v18, %v1013_v17  ;;  %v883_v13 = vld [vmem:[#allocation10 + $0xce8] sm:$0xff]  ;;  %v889_v14 = vld [vmem:[#allocation10 + $0xd18] sm:$0xff]  ;;  %v882_v5 = vld [vmem:[#allocation10 + $0xce0] sm:$0xff] }
 0x20d   :  { %v888_v17 = vld [vmem:[#allocation10 + $0xd10] sm:$0xff]  ;;  %v895_v18 = vld [vmem:[#allocation10 + $0xd48] sm:$0xff] }
 0x20e   :  { %2192 = vmatpush1.bf16.msra.mxu0 %v2191_v26  ;;  %v2337_v26 = vpack.c.bf16 %v829_v20, %v823_v19  ;;  %v901_v19 = vld [vmem:[#allocation10 + $0xd78] sm:$0xff]  ;;  %v2359_v20 = vpack.c.bf16 %v888_v17, %v882_v5  ;;  %v972_v4 = vld [vmem:[#allocation10 + $0xfb0] sm:$0xff]  ;;  %v990_v5 = vld [vmem:[#allocation10 + $0x1040] sm:$0xff] }
 0x20f   :  { %2320 = vmatpush1.bf16.msra.mxu1 %v2319_v33  ;;  %2194 = vmatprep.subr.bf16.mxu0 %v2193_v34  ;;  %v828_v33 = vld [vmem:[#allocation10 + $0xb30] sm:$0xff]  ;;  %v1025_v34 = vld [vmem:[#allocation10 + $0x1158] sm:$0xff] }
 0x210   :  { %2322 = vmatprep.subr.bf16.mxu1 %v2321_v38  ;;  %v2211_v38 = vpack.c.bf16 %v1018_v25, %v1012_v24  ;;  %v2339_v2 = vpack.c.bf16 %v828_v33, %v822_v31  ;;  %v2213_v39 = vpack.c.bf16 %v1031_v35, %v1025_v34  ;;  %v907_v24 = vld [vmem:[#allocation10 + $0xda8] sm:$0xff]  ;;  %v913_v25 = vld [vmem:[#allocation10 + $0xdd8] sm:$0xff]  ;;  %v996_v17 = vld [vmem:[#allocation10 + $0x1070] sm:$0xff] }
 0x211   :  { %v2365_v31 = vpack.c.bf16 %v913_v25, %v907_v24  ;;  %v919_v33 = vld [vmem:[#allocation10 + $0xe08] sm:$0xff]  ;;  %v925_v34 = vld [vmem:[#allocation10 + $0xe38] sm:$0xff] }
 0x212   :  { %2196 = vmatpush1.bf16.msra.mxu0 %v2195_v44  ;;  %v2341_v44 = vpack.c.bf16 %v841_v37, %v835_v36  ;;  %v2369_v36 = vpack.c.bf16 %v925_v34, %v919_v33  ;;  %v918_v37 = vld [vmem:[#allocation10 + $0xe00] sm:$0xff]  ;;  %v1015_v24 = vld [vmem:[#allocation10 + $0x1108] sm:$0xff]  ;;  %v1021_v25 = vld [vmem:[#allocation10 + $0x1138] sm:$0xff] }
 0x213   :  { %2324 = vmatpush1.bf16.msra.mxu1 %v2323_v45  ;;  %2198 = vmatprep.subr.bf16.mxu0 %v2197_v41  ;;  %v840_v45 = vld [vmem:[#allocation10 + $0xb90] sm:$0xff]  ;;  %v1037_v41 = vld [vmem:[#allocation10 + $0x11b8] sm:$0xff]  ;;  %v1027_v33 = vld [vmem:[#allocation10 + $0x1168] sm:$0xff] }
 0x214   :  { %2326 = vmatprep.subr.bf16.mxu1 %v2325_v49  ;;  %v2215_v49 = vpack.c.bf16 %v1030_v42, %v1024_v40  ;;  %v2343_v50 = vpack.c.bf16 %v840_v45, %v834_v43  ;;  %v2217_v51 = vpack.c.bf16 %v1043_v46, %v1037_v41  ;;  %v930_v43 = vld [vmem:[#allocation10 + $0xe60] sm:$0xff]  ;;  %v943_v41 = vld [vmem:[#allocation10 + $0xec8] sm:$0xff]  ;;  %v949_v46 = vld [vmem:[#allocation10 + $0xef8] sm:$0xff] }
 0x215   :  { %v1033_v34 = vld [vmem:[#allocation10 + $0x1198] sm:$0xff] }
 0x216   :  { %2200 = vmatpush1.bf16.msra.mxu0 %v2199_v55  ;;  %v846_v55 = vld [vmem:[#allocation10 + $0xbc0] sm:$0xff] }
 0x217   :  { %2328 = vmatpush1.bf16.msra.mxu1 %v2327_v57  ;;  %2202 = vmatprep.subr.bf16.mxu0 %v2201_v58  ;;  %v852_v57 = vld [vmem:[#allocation10 + $0xbf0] sm:$0xff]  ;;  %v859_v58 = vld [vmem:[#allocation10 + $0xc28] sm:$0xff] }
 0x218   :  { %2330 = vmatprep.subr.bf16.mxu1 %v2329_v1  ;;  %v2347_v62 = vpack.c.bf16 %v852_v57, %v846_v55  ;;  %v2349_v1 = vpack.c.bf16 %v865_v60, %v859_v58  ;;  %v2381_v55 = vpack.c.bf16 %v961_v53, %v955_v52  ;;  %v954_v57 = vld [vmem:[#allocation10 + $0xf20] sm:$0xff]  ;;  %v960_v58 = vld [vmem:[#allocation10 + $0xf50] sm:$0xff]  ;;  %v967_v60 = vld [vmem:[#allocation10 + $0xf88] sm:$0xff] }
 0x21a   :  { %2204 = vmatpush1.bf16.msra.mxu0 %v2203_v9  ;;  %v2353_v9 = vpack.c.bf16 %v877_v8, %v871_v7  ;;  %v979_v7 = vld [vmem:[#allocation10 + $0xfe8] sm:$0xff]  ;;  %v985_v8 = vld [vmem:[#allocation10 + $0x1018] sm:$0xff] }
 0x21b   :  { %2332 = vmatpush1.bf16.msra.mxu1 %v2331_v10  ;;  %2206 = vmatprep.subr.bf16.mxu0 %v2205_v12  ;;  %v870_v10 = vld [vmem:[#allocation10 + $0xc80] sm:$0xff]  ;;  %v876_v12 = vld [vmem:[#allocation10 + $0xcb0] sm:$0xff] }
 0x21c   :  { %2334 = vmatprep.subr.bf16.mxu1 %v2333_v16  ;;  %v2355_v15 = vpack.c.bf16 %v876_v12, %v870_v10  ;;  %v2357_v16 = vpack.c.bf16 %v889_v14, %v883_v13  ;;  %v978_v10 = vld [vmem:[#allocation10 + $0xfe0] sm:$0xff]  ;;  %v984_v12 = vld [vmem:[#allocation10 + $0x1010] sm:$0xff]  ;;  %v991_v13 = vld [vmem:[#allocation10 + $0x1048] sm:$0xff] }
 0x21d   :  { %v997_v14 = vld [vmem:[#allocation10 + $0x1078] sm:$0xff] }
 0x21e   :  { %2208 = vmatpush1.bf16.msra.mxu0 %v2207_v21  ;;  %v2361_v21 = vpack.c.bf16 %v901_v19, %v895_v18  ;;  %v1003_v18 = vld [vmem:[#allocation10 + $0x10a8] sm:$0xff]  ;;  %v1009_v19 = vld [vmem:[#allocation10 + $0x10d8] sm:$0xff] }
 0x21f   :  { %2336 = vmatpush1.bf16.msra.mxu1 %v2335_v22  ;;  %2210 = vmatprep.subr.bf16.mxu0 %v2209_v23  ;;  %v894_v22 = vld [vmem:[#allocation10 + $0xd40] sm:$0xff]  ;;  %v900_v23 = vld [vmem:[#allocation10 + $0xd70] sm:$0xff] }
 0x220   :  { %2338 = vmatprep.subr.bf16.mxu1 %v2337_v26  ;;  %v912_v26 = vld [vmem:[#allocation10 + $0xdd0] sm:$0xff] }
 0x222   :  { %2212 = vmatpush1.bf16.msra.mxu0 %v2211_v38  ;;  %v924_v38 = vld [vmem:[#allocation10 + $0xe30] sm:$0xff] }
 0x223   :  { %2340 = vmatpush1.bf16.msra.mxu1 %v2339_v2  ;;  %2214 = vmatprep.subr.bf16.mxu0 %v2213_v39  ;;  %v931_v2 = vld [vmem:[#allocation10 + $0xe68] sm:$0xff]  ;;  %v937_v39 = vld [vmem:[#allocation10 + $0xe98] sm:$0xff]  ;;  %v2371_v40 = vpack.c.bf16 %v924_v38, %v918_v37  ;;  %v1026_v37 = vld [vmem:[#allocation10 + $0x1160] sm:$0xff] }
 0x224   :  { %2342 = vmatprep.subr.bf16.mxu1 %v2341_v44  ;;  %v2373_v42 = vpack.c.bf16 %v937_v39, %v931_v2  ;;  %v936_v44 = vld [vmem:[#allocation10 + $0xe90] sm:$0xff]  ;;  %v1039_v2 = vld [vmem:[#allocation10 + $0x11c8] sm:$0xff]  ;;  %v1045_v39 = vld [vmem:[#allocation10 + $0x11f8] sm:$0xff] }
 0x225   :  { %v2375_v48 = vpack.c.bf16 %v936_v44, %v930_v43  ;;  %v1032_v38 = vld [vmem:[#allocation10 + $0x1190] sm:$0xff]  ;;  %v1038_v43 = vld [vmem:[#allocation10 + $0x11c0] sm:$0xff] }
 0x226   :  { %2216 = vmatpush1.bf16.msra.mxu0 %v2215_v49  ;;  %v2377_v49 = vpack.c.bf16 %v949_v46, %v943_v41  ;;  %v1044_v44 = vld [vmem:[#allocation10 + $0x11f0] sm:$0xff]  ;;  %v1046_v46 = vld [vmem:[#allocation11] sm:$0x3f] }
 0x227   :  { %2344 = vmatpush1.bf16.msra.mxu1 %v2343_v50  ;;  %2218 = vmatprep.subr.bf16.mxu0 %v2217_v51  ;;  %v942_v50 = vld [vmem:[#allocation10 + $0xec0] sm:$0xff]  ;;  %v948_v51 = vld [vmem:[#allocation10 + $0xef0] sm:$0xff]  ;;  %v2411_v41 = vpack.c.bf16 %v1044_v44, %v1038_v43 }
 0x228   :  { %2346 = vmatprep.subr.bf16.mxu1 %v2345_v54  ;;  %v2379_v54 = vpack.c.bf16 %v948_v51, %v942_v50 }
 0x22a   :  { %2220 = vmatpush1.bf16.msra.mxu0 %v2219_v61  ;;  %v973_v61 = vld [vmem:[#allocation10 + $0xfb8] sm:$0xff] }
 0x22b   :  { %2348 = vmatpush1.bf16.msra.mxu1 %v2347_v62  ;;  %v2383_v62 = vpack.c.bf16 %v960_v58, %v954_v57  ;;  %v1063_v57 = vrot.slane %v1046_v46, %v211_v32 }
 0x22c   :  { %2350 = vmatprep.subr.bf16.mxu1 %v2349_v1  ;;  %v2385_v1 = vpack.c.bf16 %v973_v61, %v967_v60 }
 0x22d   :  { %1498 = vmatmul.mubr.f32.vlgmr.msra.gmra.mrb[6].mxu0 %v2784_v6 }
 0x22e   :  { %1640 = vmatmul.mubr.f32.vlgmr.msra.gmra.mrb[4].mxu1 %v2763_v11  ;;  %v2363_v11 = vpack.c.bf16 %v900_v23, %v894_v22  ;;  %v1002_v22 = vld [vmem:[#allocation10 + $0x10a0] sm:$0xff]  ;;  %v1008_v23 = vld [vmem:[#allocation10 + $0x10d0] sm:$0xff] }
 0x22f   :  { %2352 = vmatpush1.bf16.msra.mxu1 %v2351_v59  ;;  %1710 = vmatprep.mubr.f32.mxu1 %v2776_v63  ;;  %v906_v63 = vld [vmem:[#allocation10 + $0xda0] sm:$0xff]  ;;  %v2387_v59 = vpack.c.bf16 %v972_v4, %v966_v3 }
 0x230   :  { %2354 = vmatprep.subr.bf16.mxu1 %v2353_v9  ;;  %v2367_v35 = vpack.c.bf16 %v912_v26, %v906_v63  ;;  %v2389_v9 = vpack.c.bf16 %v985_v8, %v979_v7  ;;  %v1014_v63 = vld [vmem:[#allocation10 + $0x1100] sm:$0xff]  ;;  %v1020_v26 = vld [vmem:[#allocation10 + $0x1130] sm:$0xff] }
 0x233   :  { %2356 = vmatpush1.bf16.msra.mxu1 %v2355_v15  ;;  %v2391_v15 = vpack.c.bf16 %v984_v12, %v978_v10 }
 0x234   :  { %2358 = vmatprep.subr.bf16.mxu1 %v2357_v16  ;;  %v2393_v16 = vpack.c.bf16 %v997_v14, %v991_v13 }
 0x237   :  { %2360 = vmatpush1.bf16.msra.mxu1 %v2359_v20  ;;  %v2395_v20 = vpack.c.bf16 %v996_v17, %v990_v5 }
 0x238   :  { %2362 = vmatprep.subr.bf16.mxu1 %v2361_v21  ;;  %v2397_v21 = vpack.c.bf16 %v1009_v19, %v1003_v18 }
 0x23b   :  { %2364 = vmatpush1.bf16.msra.mxu1 %v2363_v11  ;;  %v2399_v11 = vpack.c.bf16 %v1008_v23, %v1002_v22 }
 0x23c   :  { %2366 = vmatprep.subr.bf16.mxu1 %v2365_v31  ;;  %v2401_v31 = vpack.c.bf16 %v1021_v25, %v1015_v24 }
 0x23f   :  { %2368 = vmatpush1.bf16.msra.mxu1 %v2367_v35  ;;  %v2403_v35 = vpack.c.bf16 %v1020_v26, %v1014_v63 }
 0x240   :  { %2370 = vmatprep.subr.bf16.mxu1 %v2369_v36  ;;  %v2797_v45 = vpop.f32.mrb[4].mxu0  ;;  %v2405_v36 = vpack.c.bf16 %v1033_v34, %v1027_v33 }
 0x241   :  { %v2799_v47 = vpop.f32.mrb[5].mxu0 }
 0x243   :  { %2372 = vmatpush1.bf16.msra.mxu1 %v2371_v40  ;;  %v2407_v40 = vpack.c.bf16 %v1032_v38, %v1026_v37 }
 0x244   :  { %2374 = vmatprep.subr.bf16.mxu1 %v2373_v42  ;;  %v2409_v42 = vpack.c.bf16 %v1045_v39, %v1039_v2 }
 0x247   :  { %2376 = vmatpush1.bf16.msra.mxu1 %v2375_v48  ;;  %v1051_v48 = vrot.slane %v1046_v46, %v199_v28 }
 0x248   :  { %2378 = vmatprep.subr.bf16.mxu1 %v2377_v49  ;;  %v1055_v49 = vrot.slane %v1046_v46, %v203_v30 }
 0x249   :  { %v1145_v50 = vadd.f32 %v2797_v45, %v1051_v48  ;;  %v1067_v45 = vrot.slane %v1046_v46, %v215_v56 }
 0x24a   :  { %v1147_v51 = vadd.f32 %v2799_v47, %v1055_v49  ;;  %v1071_v47 = vrot.slane %v1046_v46, %v219_v0 }
 0x24b   :  { %2380 = vmatpush1.bf16.msra.mxu1 %v2379_v54 }
 0x24c   :  { %2382 = vmatprep.subr.bf16.mxu1 %v2381_v55 }
 0x24f   :  { %2384 = vmatpush1.bf16.msra.mxu1 %v2383_v62 }
 0x250   :  { %2386 = vmatprep.subr.bf16.mxu1 %v2385_v1 }
 0x253   :  { %2388 = vmatpush1.bf16.msra.mxu1 %v2387_v59 }
 0x254   :  { %2390 = vmatprep.subr.bf16.mxu1 %v2389_v9 }
 0x257   :  { %2392 = vmatpush1.bf16.msra.mxu1 %v2391_v15 }
 0x258   :  { %2394 = vmatprep.subr.bf16.mxu1 %v2393_v16 }
 0x25b   :  { %2396 = vmatpush1.bf16.msra.mxu1 %v2395_v20 }
 0x25c   :  { %2398 = vmatprep.subr.bf16.mxu1 %v2397_v21 }
 0x25f   :  { %2400 = vmatpush1.bf16.msra.mxu1 %v2399_v11 }
 0x260   :  { %2402 = vmatprep.subr.bf16.mxu1 %v2401_v31 }
 0x263   :  { %2404 = vmatpush1.bf16.msra.mxu1 %v2403_v35 }
 0x264   :  { %2406 = vmatprep.subr.bf16.mxu1 %v2405_v36 }
 0x267   :  { %2408 = vmatpush1.bf16.msra.mxu1 %v2407_v40 }
 0x268   :  { %2410 = vmatprep.subr.bf16.mxu1 %v2409_v42 }
 0x26b   :  { %2412 = vmatpush1.bf16.msra.mxu1 %v2411_v41 }
 0x26e   :  { %1711 = vmatmul.mubr.f32.vlgmr.msra.gmra.mrb[4].mxu1 %v2784_v6  ;;  %v1059_v6 = vrot.slane %v1046_v46, %v207_v29 }
 0x281   :  { %v1286_v52 = vpop.f32.mrb[2].mxu1 }
 0x282   :  { %v2414_v53 = vadd.f32 %v1286_v52, %v1145_v50  ;;  %v1288_v54 = vpop.f32.mrb[3].mxu1 }
 0x283   :  { %v2416_v55 = vadd.f32 %v1288_v54, %v1147_v51 }
 0x284   :  { %1717 = vst [vmem:[#allocation13] sm:$0xff] %v2414_v53 }
 0x285   :  { %1718 = vst [vmem:[#allocation13 + $0x8] sm:$0xff] %v2416_v55 }
 0x300   :  { %v1499_v28 = vpop.f32.mrb[6].mxu0 }
 0x301   :  { %v2417_v58 = vadd.f32 %v1499_v28, %v1059_v6  ;;  %v1501_v60 = vpop.f32.mrb[7].mxu0 }
 0x302   :  { %v2418_v30 = vadd.f32 %v1501_v60, %v1063_v57 }
 0x303   :  { %1719 = vst [vmem:[#allocation13 + $0x10] sm:$0xff] %v2417_v58 }
 0x304   :  { %1720 = vst [vmem:[#allocation13 + $0x18] sm:$0xff] %v2418_v30 }
 0x341   :  { %v1712_v61 = vpop.f32.mrb[4].mxu1 }
 0x342   :  { %v2419_v62 = vadd.f32 %v1712_v61, %v1067_v45  ;;  %v1714_v29 = vpop.f32.mrb[5].mxu1 }
 0x343   :  { %v2420_v1 = vadd.f32 %v1714_v29, %v1071_v47 }
 0x344   :  { %1721 = vst [vmem:[#allocation13 + $0x20] sm:$0xff] %v2419_v62 }
 0x345   :  { %1722 = vst [vmem:[#allocation13 + $0x28] sm:$0xff] %v2420_v1 }
 0x346   :  { %2584 = shalt.err (!%p2581_p10)
}
 0x347   :  { %s2585_s1 = scalar_lea.hbm %s2834_s6, 768 }
 0x348   :  { %p2586_p11 = scmp.ne.s32.totalorder %s2834_s6, %s2585_s1  ;;  %p2589_p12 = scmp.lt.u32.totalorder %s2585_s1, %s2834_s6 }
 0x34a   :  { %p2591_p13 = pnand %p2589_p12, %p2586_p11 }
 0x34c   :  { %2594 = shalt.err (!%p2591_p13)
}
 0x34d   :  { %1732 = dma.vmem_to_hbm [thread:$0]  %s1730_s16, 768, %s2834_s6, [#allocation4]  }
 0x34e   :  { %2603 = dma.done.wait [#allocation4], 768  }
 0x34f   :  { %2604 = vsyncadd [#allocation4], 4294966528 }
 0x350   :  { %1736 = vsyncpa [#allocation3], 1 }
 0x351   :  { %1737 = vsyncpa [#allocation6], 1 }
 0x352   :  { %1738 = vsyncpa [#allocation9], 1 }
 0x353   :  { %1739 = vsyncpa [#allocation12], 1 }
 0x354   :  { %1740 = vsyncpa [#allocation4], 1 }

</bundles_post_ra>
